<compile_context>
chip_gen: v7x
topology: tpu7x:2x2x1
jax: 0.10.0
libtpu: 0.0.40
codegen_flags: <defaults>
</compile_context>

<pallas_src>
import functools

import numpy as np
import jax
import jax.numpy as jnp
from jax.experimental import pallas as pl
from jax.experimental.pallas import tpu as pltpu

BN_EPS = 1e-5
LEAKY_SLOPE = 0.1
MAX_TM, MAX_TN, MAX_TK = 256, 256, 2048


def _round_up(x, m):
    return (x + m - 1) // m * m


def _pick_tiles(M, N, K):
    tm = min(MAX_TM, _round_up(M, 8))
    tn = min(MAX_TN, _round_up(N, 128))
    kp = _round_up(K, 128)
    if kp <= MAX_TK:
        tk = kp
    else:
        tk = 512
        kp = _round_up(K, tk)
    return tm, tn, tk, _round_up(M, tm), _round_up(N, tn), kp


# ----------------------------------------------------------------------------
# Pallas kernel 1: bf16 matmul + bias epilogue        (conv via im2col)
# ----------------------------------------------------------------------------
def _matmul_bias_kernel(a_ref, b_ref, bias_ref, o_ref, acc_ref):
    @pl.when(pl.program_id(2) == 0)
    def _():
        acc_ref[...] = jnp.zeros_like(acc_ref)

    acc_ref[...] += jnp.dot(a_ref[...], b_ref[...],
                            preferred_element_type=jnp.float32)

    @pl.when(pl.program_id(2) == pl.num_programs(2) - 1)
    def _():
        o_ref[...] = (acc_ref[...] + bias_ref[...]).astype(o_ref.dtype)


# ----------------------------------------------------------------------------
# Pallas kernel 2: fused [per-K BN affine + LeakyReLU] -> bf16 matmul -> +bias
# ----------------------------------------------------------------------------
def _bn_act_matmul_bias_kernel(a_ref, s_ref, t_ref, b_ref, bias_ref, o_ref, acc_ref):
    @pl.when(pl.program_id(2) == 0)
    def _():
        acc_ref[...] = jnp.zeros_like(acc_ref)

    v = a_ref[...] * s_ref[...] + t_ref[...]          # BN affine (per input channel)
    v = jnp.where(v > 0, v, LEAKY_SLOPE * v)          # LeakyReLU(0.1)
    acc_ref[...] += jnp.dot(v.astype(jnp.bfloat16), b_ref[...],
                            preferred_element_type=jnp.float32)

    @pl.when(pl.program_id(2) == pl.num_programs(2) - 1)
    def _():
        o_ref[...] = (acc_ref[...] + bias_ref[...]).astype(o_ref.dtype)


def conv_matmul(a, w, bias, *, scale=None, shift=None):
    """a: (M, K) f32; w: (K, N) f32; bias: (N,) f32 -> (M, N) f32.

    If scale/shift are given, a per-K affine + LeakyReLU prologue is fused onto `a`
    inside the kernel (this is how BN+act is fused into the following 1x1 conv)."""
    M, K = a.shape
    _, N = w.shape
    fused = scale is not None
    tm, tn, tk, Mp, Np, Kp = _pick_tiles(M, N, K)
    grid = (Mp // tm, Np // tn, Kp // tk)

    w_p = jnp.pad(w.astype(jnp.bfloat16), ((0, Kp - K), (0, Np - N)))
    bias_p = jnp.pad(bias.astype(jnp.float32), (0, Np - N)).reshape(1, Np)

    cost = pl.CostEstimate(
        flops=2 * Mp * Np * Kp,
        transcendentals=0,
        bytes_accessed=Mp * Kp * (4 if fused else 2) + Kp * Np * 2 + Mp * Np * 4)

    if fused:
        a_p = jnp.pad(a.astype(jnp.float32), ((0, Mp - M), (0, Kp - K)))
        s_p = jnp.pad(scale.astype(jnp.float32), (0, Kp - K)).reshape(1, Kp)
        t_p = jnp.pad(shift.astype(jnp.float32), (0, Kp - K)).reshape(1, Kp)
        kernel = _bn_act_matmul_bias_kernel
        in_specs = [pl.BlockSpec((tm, tk), lambda i, j, k: (i, k)),
                    pl.BlockSpec((1, tk), lambda i, j, k: (0, k)),
                    pl.BlockSpec((1, tk), lambda i, j, k: (0, k)),
                    pl.BlockSpec((tk, tn), lambda i, j, k: (k, j)),
                    pl.BlockSpec((1, tn), lambda i, j, k: (0, j))]
        operands = (a_p, s_p, t_p, w_p, bias_p)
    else:
        a_p = jnp.pad(a.astype(jnp.bfloat16), ((0, Mp - M), (0, Kp - K)))
        kernel = _matmul_bias_kernel
        in_specs = [pl.BlockSpec((tm, tk), lambda i, j, k: (i, k)),
                    pl.BlockSpec((tk, tn), lambda i, j, k: (k, j)),
                    pl.BlockSpec((1, tn), lambda i, j, k: (0, j))]
        operands = (a_p, w_p, bias_p)

    out = pl.pallas_call(
        kernel,
        out_shape=jax.ShapeDtypeStruct((Mp, Np), jnp.float32),
        grid_spec=pltpu.PrefetchScalarGridSpec(
            num_scalar_prefetch=0,
            grid=grid,
            in_specs=in_specs,
            out_specs=pl.BlockSpec((tm, tn), lambda i, j, k: (i, j)),
            scratch_shapes=[pltpu.VMEM((tm, tn), jnp.float32)]),
        compiler_params=pltpu.CompilerParams(
            dimension_semantics=("parallel", "parallel", "arbitrary")),
        cost_estimate=cost,
    )(*operands)
    return out[:M, :N]


# ----------------------------------------------------------------------------
# Pallas kernel 3: single-pass per-channel sum / sum-of-squares (BN batch stats)
# ----------------------------------------------------------------------------
def _col_stats_kernel(y_ref, sum_ref, sq_ref):
    @pl.when(pl.program_id(0) == 0)
    def _():
        sum_ref[...] = jnp.zeros_like(sum_ref)
        sq_ref[...] = jnp.zeros_like(sq_ref)
    v = y_ref[...]
    sum_ref[...] += jnp.sum(v, axis=0, keepdims=True)
    sq_ref[...] += jnp.sum(v * v, axis=0, keepdims=True)


def channel_sums(y):
    """y: (M, C) f32 -> (sum, sumsq) over rows, each shape (C,). One HBM pass."""
    M, C = y.shape
    Cp = _round_up(C, 128)
    br = min(1024, _round_up(M, 8))
    Mp = _round_up(M, br)
    y_p = jnp.pad(y, ((0, Mp - M), (0, Cp - C)))        # zero rows/cols: no effect on sums
    s, q = pl.pallas_call(
        _col_stats_kernel,
        out_shape=(jax.ShapeDtypeStruct((1, Cp), jnp.float32),
                   jax.ShapeDtypeStruct((1, Cp), jnp.float32)),
        grid_spec=pltpu.PrefetchScalarGridSpec(
            num_scalar_prefetch=0,
            grid=(Mp // br,),
            in_specs=[pl.BlockSpec((br, Cp), lambda i: (i, 0))],
            out_specs=(pl.BlockSpec((1, Cp), lambda i: (0, 0)),
                       pl.BlockSpec((1, Cp), lambda i: (0, 0)))),
        compiler_params=pltpu.CompilerParams(dimension_semantics=("arbitrary",)),
    )(y_p)
    return s[0, :C], q[0, :C]


# ----------------------------------------------------------------------------
# Glue (layout only): im2col patch extraction, reshapes, output permute
# ----------------------------------------------------------------------------
def _im2col(x, kh, kw, stride, padding):
    """x: (N, H, W, C) -> patches (N*Hout*Wout, kh*kw*C), feature order (kh, kw, Cin)."""
    N, H, W, C = x.shape
    if padding > 0:
        x = jnp.pad(x, ((0, 0), (padding, padding), (padding, padding), (0, 0)))
    Hp, Wp = x.shape[1], x.shape[2]
    Hout = (Hp - kh) // stride + 1
    Wout = (Wp - kw) // stride + 1
    cols = []
    for i in range(kh):
        for j in range(kw):
            cols.append(x[:, i:i + (Hout - 1) * stride + 1:stride,
                          j:j + (Wout - 1) * stride + 1:stride, :])
    patches = jnp.concatenate(cols, axis=-1)
    return patches.reshape(N * Hout * Wout, kh * kw * C), Hout, Wout


def scale_prediction_forward(params, x_nchw, num_classes):
    N, Cin, H, W = x_nchw.shape
    x = jnp.transpose(x_nchw, (0, 2, 3, 1)).astype(jnp.float32)   # NCHW -> NHWC

    # conv1: 3x3, pad 1 (bias fused in matmul epilogue, bf16 MXU, f32 accumulation)
    patches, Hout, Wout = _im2col(x, 3, 3, 1, 1)
    C1 = params["w1"].shape[0]
    w1 = jnp.transpose(params["w1"], (2, 3, 1, 0)).reshape(9 * Cin, C1)
    y1 = conv_matmul(patches, w1, params["b1"])                    # (M, C1) f32

    # BatchNorm2d (training mode: batch stats, biased variance) -> scale/shift
    M = y1.shape[0]
    s1, s2 = channel_sums(y1)
    mean = s1 / M
    var = s2 / M - mean * mean
    scale = params["gamma"] * jax.lax.rsqrt(var + BN_EPS)
    shift = params["beta"] - mean * scale

    # conv2: 1x1 with BN affine + LeakyReLU fused as prologue, bias in epilogue
    Cout = params["w2"].shape[0]
    w2 = jnp.transpose(params["w2"], (2, 3, 1, 0)).reshape(C1, Cout)
    y2 = conv_matmul(y1, w2, params["b2"], scale=scale, shift=shift)  # (M, Cout) f32

    y2 = y2.reshape(N, Hout, Wout, 3, num_classes + 5)
    return jnp.transpose(y2, (0, 3, 1, 2, 4))                      # (N, 3, H, W, nc+5)


# ----------------------------------------------------------------------------
# Plain-JAX f32 reference (for tolerance validation of the bf16 kernels)
# ----------------------------------------------------------------------------
def reference_forward(params, x_nchw, num_classes):
    x = jnp.transpose(x_nchw, (0, 2, 3, 1)).astype(jnp.float32)
    N, H, W, Cin = x.shape
    patches, Hout, Wout = _im2col(x, 3, 3, 1, 1)
    C1 = params["w1"].shape[0]
    w1 = jnp.transpose(params["w1"], (2, 3, 1, 0)).reshape(9 * Cin, C1)
    y1 = patches @ w1 + params["b1"][None, :]
    mean = jnp.mean(y1, axis=0)
    var = jnp.mean((y1 - mean) ** 2, axis=0)
    y1 = (y1 - mean) * (params["gamma"] * jax.lax.rsqrt(var + BN_EPS)) + params["beta"]
    y1 = jnp.where(y1 > 0, y1, LEAKY_SLOPE * y1)
    Cout = params["w2"].shape[0]
    w2 = jnp.transpose(params["w2"], (2, 3, 1, 0)).reshape(C1, Cout)
    y2 = y1 @ w2 + params["b2"][None, :]
    y2 = y2.reshape(N, Hout, Wout, 3, num_classes + 5)
    return jnp.transpose(y2, (0, 3, 1, 2, 4))


# ----------------------------------------------------------------------------
# Deterministic parameter init
# ----------------------------------------------------------------------------
def init_scale_prediction(key, in_channels, num_classes):
    c1 = 2 * in_channels
    cout = 3 * (num_classes + 5)
    k1, k2, k3, k4, k5, k6 = jax.random.split(key, 6)
    return {
        "w1": (jax.random.normal(k1, (c1, in_channels, 3, 3), jnp.float32)
               / np.sqrt(9 * in_channels)),
        "b1": 0.05 * jax.random.normal(k2, (c1,), jnp.float32),
        "gamma": 1.0 + 0.1 * jax.random.normal(k3, (c1,), jnp.float32),
        "beta": 0.1 * jax.random.normal(k4, (c1,), jnp.float32),
        "w2": (jax.random.normal(k5, (cout, c1, 1, 1), jnp.float32)
               / np.sqrt(c1)),
        "b2": 0.01 * jax.random.normal(k6, (cout,), jnp.float32),
    }


if __name__ == "__main__":
    key = jax.random.PRNGKey(0)
    k_param, k_x = jax.random.split(key)

    in_channels, num_classes = 64, 20
    batch, H, W = 2, 16, 16

    params = init_scale_prediction(k_param, in_channels, num_classes)
    x = jax.random.normal(k_x, (batch, in_channels, H, W), jnp.float32)  # NCHW like PyTorch

    fwd = jax.jit(functools.partial(scale_prediction_forward, num_classes=num_classes))
    out = jax.block_until_ready(fwd(params, x))

    assert out.shape == (batch, 3, H, W, num_classes + 5), out.shape
    assert bool(jnp.all(jnp.isfinite(out)))

    ref = jax.block_until_ready(reference_forward(params, x, num_classes))
    max_err = float(jnp.max(jnp.abs(out - ref)))
    tol = 5e-2 + 5e-2 * float(jnp.max(jnp.abs(ref)))   # bf16-input matmul tolerance
    assert max_err < tol, (max_err, tol)

    print("KERNEL_OK")
</pallas_src>

<mosaic_0001>
module attributes {stable_mosaic.version = 11 : i64} {
  func.func @_col_stats_kernel(%arg0: i32, %arg1: memref<512x128xf32, #tpu.memory_space<vmem>>, %arg2: memref<1x128xf32, #tpu.memory_space<vmem>>, %arg3: memref<1x128xf32, #tpu.memory_space<vmem>>) attributes {dimension_semantics = [#tpu.dimension_semantics<arbitrary>], iteration_bounds = array<i64: 1>, scalar_prefetch = 0 : i64, scratch_operands = 0 : i64, tpu.core_type = #tpu.core_type<tc>, window_params = [{transform_indices = @transform_0, window_bounds = array<i64: 512, 128>}, {pipeline_mode = #tpu.pipeline_mode<synchronous>, transform_indices = @transform_1, window_bounds = array<i64: 1, 128>}, {pipeline_mode = #tpu.pipeline_mode<synchronous>, transform_indices = @transform_2, window_bounds = array<i64: 1, 128>}]} {
    %c0_i32 = arith.constant 0 : i32
    %0 = arith.cmpi eq, %arg0, %c0_i32 : i32
    %1 = arith.extui %0 : i1 to i32
    %c0_i32_0 = arith.constant 0 : i32
    %2 = arith.cmpi ne, %1, %c0_i32_0 : i32
    scf.if %2 {
      %cst_11 = arith.constant 0.000000e+00 : f32
      %15 = vector.broadcast %cst_11 : f32 to vector<1x128xf32>
      %c0_12 = arith.constant 0 : index
      %c0_13 = arith.constant 0 : index
      %16 = vector.load %arg2[%c0_12, %c0_13] : memref<1x128xf32, #tpu.memory_space<vmem>>, vector<1x128xf32>
      tpu.vector_store %arg2[%c0_12, %c0_13], %15 {strides = array<i32>} : memref<1x128xf32, #tpu.memory_space<vmem>>, vector<1x128xf32>,
      %cst_14 = arith.constant 0.000000e+00 : f32
      %17 = vector.broadcast %cst_14 : f32 to vector<1x128xf32>
      %c0_15 = arith.constant 0 : index
      %c0_16 = arith.constant 0 : index
      %18 = vector.load %arg3[%c0_15, %c0_16] : memref<1x128xf32, #tpu.memory_space<vmem>>, vector<1x128xf32>
      tpu.vector_store %arg3[%c0_15, %c0_16], %17 {strides = array<i32>} : memref<1x128xf32, #tpu.memory_space<vmem>>, vector<1x128xf32>,
    } else {
    }
    %c0 = arith.constant 0 : index
    %c0_1 = arith.constant 0 : index
    %3 = vector.load %arg1[%c0, %c0_1] : memref<512x128xf32, #tpu.memory_space<vmem>>, vector<512x128xf32>
    %c0_2 = arith.constant 0 : index
    %c0_3 = arith.constant 0 : index
    %4 = vector.load %arg2[%c0_2, %c0_3] : memref<1x128xf32, #tpu.memory_space<vmem>>, vector<1x128xf32>
    %cst = arith.constant dense<0.000000e+00> : vector<128xf32>
    %5 = vector.multi_reduction <add>, %3, %cst [0] : vector<512x128xf32> to vector<128xf32>
    %6 = vector.shape_cast %5 : vector<128xf32> to vector<1x128xf32>
    %7 = arith.addf %4, %6 : vector<1x128xf32>
    %c0_4 = arith.constant 0 : index
    %c0_5 = arith.constant 0 : index
    %8 = vector.load %arg2[%c0_4, %c0_5] : memref<1x128xf32, #tpu.memory_space<vmem>>, vector<1x128xf32>
    tpu.vector_store %arg2[%c0_4, %c0_5], %7 {strides = array<i32>} : memref<1x128xf32, #tpu.memory_space<vmem>>, vector<1x128xf32>,
    %c0_6 = arith.constant 0 : index
    %c0_7 = arith.constant 0 : index
    %9 = vector.load %arg3[%c0_6, %c0_7] : memref<1x128xf32, #tpu.memory_space<vmem>>, vector<1x128xf32>
    %10 = arith.mulf %3, %3 : vector<512x128xf32>
    %cst_8 = arith.constant dense<0.000000e+00> : vector<128xf32>
    %11 = vector.multi_reduction <add>, %10, %cst_8 [0] : vector<512x128xf32> to vector<128xf32>
    %12 = vector.shape_cast %11 : vector<128xf32> to vector<1x128xf32>
    %13 = arith.addf %9, %12 : vector<1x128xf32>
    %c0_9 = arith.constant 0 : index
    %c0_10 = arith.constant 0 : index
    %14 = vector.load %arg3[%c0_9, %c0_10] : memref<1x128xf32, #tpu.memory_space<vmem>>, vector<1x128xf32>
    tpu.vector_store %arg3[%c0_9, %c0_10], %13 {strides = array<i32>} : memref<1x128xf32, #tpu.memory_space<vmem>>, vector<1x128xf32>,
    return
  }
  func.func @transform_0(%arg0: i32) -> (i32, i32) {
    %c0_i32 = arith.constant 0 : i32
    %c0_i32_0 = arith.constant 0 : i32
    return %arg0, %c0_i32 : i32, i32
  }
  func.func @transform_1(%arg0: i32) -> (i32, i32) {
    %c0_i32 = arith.constant 0 : i32
    %c0_i32_0 = arith.constant 0 : i32
    %c0_i32_1 = arith.constant 0 : i32
    return %c0_i32, %c0_i32_0 : i32, i32
  }
  func.func @transform_2(%arg0: i32) -> (i32, i32) {
    %c0_i32 = arith.constant 0 : i32
    %c0_i32_0 = arith.constant 0 : i32
    %c0_i32_1 = arith.constant 0 : i32
    return %c0_i32, %c0_i32_0 : i32, i32
  }
}

module attributes {stable_mosaic.version = 11 : i64} {
  func.func @_matmul_bias_kernel(%arg0: i32, %arg1: i32, %arg2: i32, %arg3: memref<256x640xbf16, #tpu.memory_space<vmem>>, %arg4: memref<640x128xbf16, #tpu.memory_space<vmem>>, %arg5: memref<1x128xf32, #tpu.memory_space<vmem>>, %arg6: memref<256x128xf32, #tpu.memory_space<vmem>>, %arg7: memref<256x128xf32, #tpu.memory_space<vmem>>) attributes {dimension_semantics = [#tpu.dimension_semantics<parallel>, #tpu.dimension_semantics<parallel>, #tpu.dimension_semantics<arbitrary>], iteration_bounds = array<i64: 2, 1, 1>, scalar_prefetch = 0 : i64, scratch_operands = 1 : i64, tpu.core_type = #tpu.core_type<tc>, window_params = [{transform_indices = @transform_0, window_bounds = array<i64: 256, 640>}, {transform_indices = @transform_1, window_bounds = array<i64: 640, 128>}, {transform_indices = @transform_2, window_bounds = array<i64: 1, 128>}, {transform_indices = @transform_3, window_bounds = array<i64: 256, 128>}]} {
    %c0_i32 = arith.constant 0 : i32
    %0 = arith.cmpi eq, %arg2, %c0_i32 : i32
    %1 = arith.extui %0 : i1 to i32
    %c0_i32_0 = arith.constant 0 : i32
    %2 = arith.cmpi ne, %1, %c0_i32_0 : i32
    scf.if %2 {
      %cst_10 = arith.constant 0.000000e+00 : f32
      %12 = vector.broadcast %cst_10 : f32 to vector<256x128xf32>
      %c0_11 = arith.constant 0 : index
      %c0_12 = arith.constant 0 : index
      %13 = vector.load %arg7[%c0_11, %c0_12] : memref<256x128xf32, #tpu.memory_space<vmem>>, vector<256x128xf32>
      tpu.vector_store %arg7[%c0_11, %c0_12], %12 {strides = array<i32>} : memref<256x128xf32, #tpu.memory_space<vmem>>, vector<256x128xf32>,
    } else {
    }
    %c0 = arith.constant 0 : index
    %c0_1 = arith.constant 0 : index
    %3 = vector.load %arg7[%c0, %c0_1] : memref<256x128xf32, #tpu.memory_space<vmem>>, vector<256x128xf32>
    %c0_2 = arith.constant 0 : index
    %c0_3 = arith.constant 0 : index
    %4 = vector.load %arg3[%c0_2, %c0_3] : memref<256x640xbf16, #tpu.memory_space<vmem>>, vector<256x640xbf16>
    %c0_4 = arith.constant 0 : index
    %c0_5 = arith.constant 0 : index
    %5 = vector.load %arg4[%c0_4, %c0_5] : memref<640x128xbf16, #tpu.memory_space<vmem>>, vector<640x128xbf16>
    %cst = arith.constant dense<0.000000e+00> : vector<256x128xf32>
    %6 = tpu.matmul %4, %5, %cst {dimension_numbers = #tpu.dot_dimension_numbers<[1], [0], [0], [1], [0, 0, 1, 1], [], []>} : vector<256x640xbf16>, vector<640x128xbf16>, vector<256x128xf32> -> vector<256x128xf32>
    %7 = arith.addf %3, %6 : vector<256x128xf32>
    %c0_6 = arith.constant 0 : index
    %c0_7 = arith.constant 0 : index
    %8 = vector.load %arg7[%c0_6, %c0_7] : memref<256x128xf32, #tpu.memory_space<vmem>>, vector<256x128xf32>
    tpu.vector_store %arg7[%c0_6, %c0_7], %7 {strides = array<i32>} : memref<256x128xf32, #tpu.memory_space<vmem>>, vector<256x128xf32>,
    %c0_i32_8 = arith.constant 0 : i32
    %9 = arith.cmpi eq, %arg2, %c0_i32_8 : i32
    %10 = arith.extui %9 : i1 to i32
    %c0_i32_9 = arith.constant 0 : i32
    %11 = arith.cmpi ne, %10, %c0_i32_9 : i32
    scf.if %11 {
      %c0_10 = arith.constant 0 : index
      %c0_11 = arith.constant 0 : index
      %12 = vector.load %arg7[%c0_10, %c0_11] : memref<256x128xf32, #tpu.memory_space<vmem>>, vector<256x128xf32>
      %c0_12 = arith.constant 0 : index
      %c0_13 = arith.constant 0 : index
      %13 = vector.load %arg5[%c0_12, %c0_13] : memref<1x128xf32, #tpu.memory_space<vmem>>, vector<1x128xf32>
      %14 = vector.broadcast %13 : vector<1x128xf32> to vector<256x128xf32>
      %15 = arith.addf %12, %14 : vector<256x128xf32>
      %c0_14 = arith.constant 0 : index
      %c0_15 = arith.constant 0 : index
      %16 = vector.load %arg6[%c0_14, %c0_15] : memref<256x128xf32, #tpu.memory_space<vmem>>, vector<256x128xf32>
      tpu.vector_store %arg6[%c0_14, %c0_15], %15 {strides = array<i32>} : memref<256x128xf32, #tpu.memory_space<vmem>>, vector<256x128xf32>,
    } else {
    }
    return
  }
  func.func @transform_0(%arg0: i32, %arg1: i32, %arg2: i32) -> (i32, i32) {
    %c0_i32 = arith.constant 0 : i32
    return %arg0, %arg2 : i32, i32
  }
  func.func @transform_1(%arg0: i32, %arg1: i32, %arg2: i32) -> (i32, i32) {
    %c0_i32 = arith.constant 0 : i32
    return %arg2, %arg1 : i32, i32
  }
  func.func @transform_2(%arg0: i32, %arg1: i32, %arg2: i32) -> (i32, i32) {
    %c0_i32 = arith.constant 0 : i32
    %c0_i32_0 = arith.constant 0 : i32
    return %c0_i32, %arg1 : i32, i32
  }
  func.func @transform_3(%arg0: i32, %arg1: i32, %arg2: i32) -> (i32, i32) {
    %c0_i32 = arith.constant 0 : i32
    return %arg0, %arg1 : i32, i32
  }
}

module attributes {stable_mosaic.version = 11 : i64} {
  func.func @_bn_act_matmul_bias_kernel(%arg0: i32, %arg1: i32, %arg2: i32, %arg3: memref<256x128xf32, #tpu.memory_space<vmem>>, %arg4: memref<1x128xf32, #tpu.memory_space<vmem>>, %arg5: memref<1x128xf32, #tpu.memory_space<vmem>>, %arg6: memref<128x128xbf16, #tpu.memory_space<vmem>>, %arg7: memref<1x128xf32, #tpu.memory_space<vmem>>, %arg8: memref<256x128xf32, #tpu.memory_space<vmem>>, %arg9: memref<256x128xf32, #tpu.memory_space<vmem>>) attributes {dimension_semantics = [#tpu.dimension_semantics<parallel>, #tpu.dimension_semantics<parallel>, #tpu.dimension_semantics<arbitrary>], iteration_bounds = array<i64: 2, 1, 1>, scalar_prefetch = 0 : i64, scratch_operands = 1 : i64, tpu.core_type = #tpu.core_type<tc>, window_params = [{transform_indices = @transform_0, window_bounds = array<i64: 256, 128>}, {transform_indices = @transform_1, window_bounds = array<i64: 1, 128>}, {transform_indices = @transform_2, window_bounds = array<i64: 1, 128>}, {transform_indices = @transform_3, window_bounds = array<i64: 128, 128>}, {transform_indices = @transform_4, window_bounds = array<i64: 1, 128>}, {transform_indices = @transform_5, window_bounds = array<i64: 256, 128>}]} {
    %c0_i32 = arith.constant 0 : i32
    %0 = arith.cmpi eq, %arg2, %c0_i32 : i32
    %1 = arith.extui %0 : i1 to i32
    %c0_i32_0 = arith.constant 0 : i32
    %2 = arith.cmpi ne, %1, %c0_i32_0 : i32
    scf.if %2 {
      %cst_16 = arith.constant 0.000000e+00 : f32
      %24 = vector.broadcast %cst_16 : f32 to vector<256x128xf32>
      %c0_17 = arith.constant 0 : index
      %c0_18 = arith.constant 0 : index
      %25 = vector.load %arg9[%c0_17, %c0_18] : memref<256x128xf32, #tpu.memory_space<vmem>>, vector<256x128xf32>
      tpu.vector_store %arg9[%c0_17, %c0_18], %24 {strides = array<i32>} : memref<256x128xf32, #tpu.memory_space<vmem>>, vector<256x128xf32>,
    } else {
    }
    %c0 = arith.constant 0 : index
    %c0_1 = arith.constant 0 : index
    %3 = vector.load %arg3[%c0, %c0_1] : memref<256x128xf32, #tpu.memory_space<vmem>>, vector<256x128xf32>
    %c0_2 = arith.constant 0 : index
    %c0_3 = arith.constant 0 : index
    %4 = vector.load %arg4[%c0_2, %c0_3] : memref<1x128xf32, #tpu.memory_space<vmem>>, vector<1x128xf32>
    %5 = vector.broadcast %4 : vector<1x128xf32> to vector<256x128xf32>
    %6 = arith.mulf %3, %5 : vector<256x128xf32>
    %c0_4 = arith.constant 0 : index
    %c0_5 = arith.constant 0 : index
    %7 = vector.load %arg5[%c0_4, %c0_5] : memref<1x128xf32, #tpu.memory_space<vmem>>, vector<1x128xf32>
    %8 = vector.broadcast %7 : vector<1x128xf32> to vector<256x128xf32>
    %9 = arith.addf %6, %8 : vector<256x128xf32>
    %cst = arith.constant 0.000000e+00 : f32
    %10 = vector.broadcast %cst : f32 to vector<256x128xf32>
    %11 = arith.cmpf ogt, %9, %10 : vector<256x128xf32>
    %cst_6 = arith.constant 1.000000e-01 : f32
    %12 = vector.broadcast %cst_6 : f32 to vector<256x128xf32>
    %13 = arith.mulf %12, %9 : vector<256x128xf32>
    %14 = arith.select %11, %9, %13 : vector<256x128xi1>, vector<256x128xf32>
    %c0_7 = arith.constant 0 : index
    %c0_8 = arith.constant 0 : index
    %15 = vector.load %arg9[%c0_7, %c0_8] : memref<256x128xf32, #tpu.memory_space<vmem>>, vector<256x128xf32>
    %16 = arith.truncf %14 : vector<256x128xf32> to vector<256x128xbf16>
    %c0_9 = arith.constant 0 : index
    %c0_10 = arith.constant 0 : index
    %17 = vector.load %arg6[%c0_9, %c0_10] : memref<128x128xbf16, #tpu.memory_space<vmem>>, vector<128x128xbf16>
    %cst_11 = arith.constant dense<0.000000e+00> : vector<256x128xf32>
    %18 = tpu.matmul %16, %17, %cst_11 {dimension_numbers = #tpu.dot_dimension_numbers<[1], [0], [0], [1], [0, 0, 1, 1], [], []>} : vector<256x128xbf16>, vector<128x128xbf16>, vector<256x128xf32> -> vector<256x128xf32>
    %19 = arith.addf %15, %18 : vector<256x128xf32>
    %c0_12 = arith.constant 0 : index
    %c0_13 = arith.constant 0 : index
    %20 = vector.load %arg9[%c0_12, %c0_13] : memref<256x128xf32, #tpu.memory_space<vmem>>, vector<256x128xf32>
    tpu.vector_store %arg9[%c0_12, %c0_13], %19 {strides = array<i32>} : memref<256x128xf32, #tpu.memory_space<vmem>>, vector<256x128xf32>,
    %c0_i32_14 = arith.constant 0 : i32
    %21 = arith.cmpi eq, %arg2, %c0_i32_14 : i32
    %22 = arith.extui %21 : i1 to i32
    %c0_i32_15 = arith.constant 0 : i32
    %23 = arith.cmpi ne, %22, %c0_i32_15 : i32
    scf.if %23 {
      %c0_16 = arith.constant 0 : index
      %c0_17 = arith.constant 0 : index
      %24 = vector.load %arg9[%c0_16, %c0_17] : memref<256x128xf32, #tpu.memory_space<vmem>>, vector<256x128xf32>
      %c0_18 = arith.constant 0 : index
      %c0_19 = arith.constant 0 : index
      %25 = vector.load %arg7[%c0_18, %c0_19] : memref<1x128xf32, #tpu.memory_space<vmem>>, vector<1x128xf32>
      %26 = vector.broadcast %25 : vector<1x128xf32> to vector<256x128xf32>
      %27 = arith.addf %24, %26 : vector<256x128xf32>
      %c0_20 = arith.constant 0 : index
      %c0_21 = arith.constant 0 : index
      %28 = vector.load %arg8[%c0_20, %c0_21] : memref<256x128xf32, #tpu.memory_space<vmem>>, vector<256x128xf32>
      tpu.vector_store %arg8[%c0_20, %c0_21], %27 {strides = array<i32>} : memref<256x128xf32, #tpu.memory_space<vmem>>, vector<256x128xf32>,
    } else {
    }
    return
  }
  func.func @transform_0(%arg0: i32, %arg1: i32, %arg2: i32) -> (i32, i32) {
    %c0_i32 = arith.constant 0 : i32
    return %arg0, %arg2 : i32, i32
  }
  func.func @transform_1(%arg0: i32, %arg1: i32, %arg2: i32) -> (i32, i32) {
    %c0_i32 = arith.constant 0 : i32
    %c0_i32_0 = arith.constant 0 : i32
    return %c0_i32, %arg2 : i32, i32
  }
  func.func @transform_2(%arg0: i32, %arg1: i32, %arg2: i32) -> (i32, i32) {
    %c0_i32 = arith.constant 0 : i32
    %c0_i32_0 = arith.constant 0 : i32
    return %c0_i32, %arg2 : i32, i32
  }
  func.func @transform_3(%arg0: i32, %arg1: i32, %arg2: i32) -> (i32, i32) {
    %c0_i32 = arith.constant 0 : i32
    return %arg2, %arg1 : i32, i32
  }
  func.func @transform_4(%arg0: i32, %arg1: i32, %arg2: i32) -> (i32, i32) {
    %c0_i32 = arith.constant 0 : i32
    %c0_i32_0 = arith.constant 0 : i32
    return %c0_i32, %arg1 : i32, i32
  }
  func.func @transform_5(%arg0: i32, %arg1: i32, %arg2: i32) -> (i32, i32) {
    %c0_i32 = arith.constant 0 : i32
    return %arg0, %arg1 : i32, i32
  }
}

</mosaic_0001>

<bundles_post_ra>
// kernel: scale_prediction_forward.4
= control target key start
LH: loop header
LB: loop body
LE: loop exit
PB: predicated region body
PF: predicated region fallthrough
CT: control target
= control target key end

     0   :  { %v297_v0 = vmov 0.0   ;;  %s523_s0 = inlined_call_operand.vmem [shape: f32[512,128], index: 0, kind: input, shape index: {}]   ;;  %s524_s1 = inlined_call_operand.vmem [shape: f32[1,128], index: 1, kind: output, shape index: {0}]   ;;  %s525_s2 = inlined_call_operand.vmem [shape: f32[1,128], index: 2, kind: output, shape index: {1}]  }
   0x1   :  { %14 = vst [vmem:[%s524_s1] sm:$0x1] %v297_v0  ;;  %15 = vst [vmem:[%s525_s2] sm:$0x1] %v297_v0  ;;  %v16_v1 = vld [vmem:[%s523_s0] sm:$0xff]  ;;  %v17_v2 = vld [vmem:[%s523_s0 + $0x8] sm:$0xff] }
   0x2   :  { %v18_v3 = vld [vmem:[%s523_s0 + $0x10] sm:$0xff]  ;;  %v19_v4 = vld [vmem:[%s523_s0 + $0x18] sm:$0xff]  ;;  %v81_v5 = vadd.f32 %v17_v2, %v16_v1  ;;  %v153_v6 = vmul.f32 %v16_v1, %v16_v1  ;;  %v154_v7 = vmul.f32 %v17_v2, %v17_v2  ;;  %v20_v9 = vld [vmem:[%s523_s0 + $0x20] sm:$0xff] }
   0x3   :  { %v155_v8 = vmul.f32 %v18_v3, %v18_v3  ;;  %v156_v11 = vmul.f32 %v19_v4, %v19_v4  ;;  %v21_v13 = vld [vmem:[%s523_s0 + $0x28] sm:$0xff]  ;;  %v157_v15 = vmul.f32 %v20_v9, %v20_v9  ;;  %v22_v17 = vld [vmem:[%s523_s0 + $0x30] sm:$0xff]  ;;  %v23_v21 = vld [vmem:[%s523_s0 + $0x38] sm:$0xff] }
   0x4   :  { %v82_v10 = vadd.f32 %v81_v5, %v18_v3  ;;  %v217_v12 = vadd.f32 %v154_v7, %v153_v6  ;;  %v158_v19 = vmul.f32 %v21_v13, %v21_v13  ;;  %v159_v23 = vmul.f32 %v22_v17, %v22_v17  ;;  %v24_v25 = vld [vmem:[%s523_s0 + $0x40] sm:$0xff]  ;;  %v25_v29 = vld [vmem:[%s523_s0 + $0x48] sm:$0xff]  ;;  %v26_v33 = vld [vmem:[%s523_s0 + $0x50] sm:$0xff] }
   0x5   :  { %v160_v27 = vmul.f32 %v23_v21, %v23_v21  ;;  %v161_v31 = vmul.f32 %v24_v25, %v24_v25  ;;  %v162_v35 = vmul.f32 %v25_v29, %v25_v29  ;;  %v27_v37 = vld [vmem:[%s523_s0 + $0x58] sm:$0xff]  ;;  %v163_v39 = vmul.f32 %v26_v33, %v26_v33  ;;  %v28_v41 = vld [vmem:[%s523_s0 + $0x60] sm:$0xff]  ;;  %v29_v45 = vld [vmem:[%s523_s0 + $0x68] sm:$0xff] }
   0x6   :  { %v83_v14 = vadd.f32 %v82_v10, %v19_v4  ;;  %v218_v16 = vadd.f32 %v217_v12, %v155_v8  ;;  %v164_v43 = vmul.f32 %v27_v37, %v27_v37  ;;  %v165_v47 = vmul.f32 %v28_v41, %v28_v41  ;;  %v30_v49 = vld [vmem:[%s523_s0 + $0x70] sm:$0xff]  ;;  %v31_v53 = vld [vmem:[%s523_s0 + $0x78] sm:$0xff]  ;;  %v32_v57 = vld [vmem:[%s523_s0 + $0x80] sm:$0xff] }
   0x7   :  { %v166_v51 = vmul.f32 %v29_v45, %v29_v45  ;;  %v167_v55 = vmul.f32 %v30_v49, %v30_v49  ;;  %v168_v59 = vmul.f32 %v31_v53, %v31_v53  ;;  %v33_v61 = vld [vmem:[%s523_s0 + $0x88] sm:$0xff]  ;;  %v169_v63 = vmul.f32 %v32_v57, %v32_v57  ;;  %v34_v1 = vld [vmem:[%s523_s0 + $0x90] sm:$0xff]  ;;  %v35_v5 = vld [vmem:[%s523_s0 + $0x98] sm:$0xff] }
   0x8   :  { %v84_v18 = vadd.f32 %v83_v14, %v20_v9  ;;  %v219_v20 = vadd.f32 %v218_v16, %v156_v11  ;;  %v170_v3 = vmul.f32 %v33_v61, %v33_v61  ;;  %v171_v7 = vmul.f32 %v34_v1, %v34_v1  ;;  %v36_v9 = vld [vmem:[%s523_s0 + $0xa0] sm:$0xff] }
   0x9   :  { %v172_v11 = vmul.f32 %v35_v5, %v35_v5 }
   0xa   :  { %v85_v22 = vadd.f32 %v84_v18, %v21_v13  ;;  %v220_v24 = vadd.f32 %v219_v20, %v157_v15  ;;  %v37_v13 = vld [vmem:[%s523_s0 + $0xa8] sm:$0xff]  ;;  %v173_v15 = vmul.f32 %v36_v9, %v36_v9 }
   0xc   :  { %v86_v26 = vadd.f32 %v85_v22, %v22_v17  ;;  %v221_v28 = vadd.f32 %v220_v24, %v158_v19  ;;  %v38_v17 = vld [vmem:[%s523_s0 + $0xb0] sm:$0xff]  ;;  %v174_v19 = vmul.f32 %v37_v13, %v37_v13 }
   0xe   :  { %v87_v30 = vadd.f32 %v86_v26, %v23_v21  ;;  %v222_v32 = vadd.f32 %v221_v28, %v159_v23  ;;  %v39_v21 = vld [vmem:[%s523_s0 + $0xb8] sm:$0xff]  ;;  %v175_v23 = vmul.f32 %v38_v17, %v38_v17 }
  0x10   :  { %v88_v34 = vadd.f32 %v87_v30, %v24_v25  ;;  %v223_v36 = vadd.f32 %v222_v32, %v160_v27  ;;  %v40_v25 = vld [vmem:[%s523_s0 + $0xc0] sm:$0xff]  ;;  %v176_v27 = vmul.f32 %v39_v21, %v39_v21 }
  0x12   :  { %v89_v38 = vadd.f32 %v88_v34, %v25_v29  ;;  %v224_v40 = vadd.f32 %v223_v36, %v161_v31  ;;  %v41_v29 = vld [vmem:[%s523_s0 + $0xc8] sm:$0xff]  ;;  %v177_v31 = vmul.f32 %v40_v25, %v40_v25 }
  0x14   :  { %v90_v42 = vadd.f32 %v89_v38, %v26_v33  ;;  %v225_v44 = vadd.f32 %v224_v40, %v162_v35  ;;  %v42_v33 = vld [vmem:[%s523_s0 + $0xd0] sm:$0xff]  ;;  %v178_v35 = vmul.f32 %v41_v29, %v41_v29 }
  0x16   :  { %v91_v46 = vadd.f32 %v90_v42, %v27_v37  ;;  %v226_v48 = vadd.f32 %v225_v44, %v163_v39  ;;  %v43_v37 = vld [vmem:[%s523_s0 + $0xd8] sm:$0xff]  ;;  %v179_v39 = vmul.f32 %v42_v33, %v42_v33 }
  0x18   :  { %v92_v50 = vadd.f32 %v91_v46, %v28_v41  ;;  %v227_v52 = vadd.f32 %v226_v48, %v164_v43  ;;  %v44_v41 = vld [vmem:[%s523_s0 + $0xe0] sm:$0xff]  ;;  %v180_v43 = vmul.f32 %v43_v37, %v43_v37 }
  0x1a   :  { %v93_v54 = vadd.f32 %v92_v50, %v29_v45  ;;  %v228_v56 = vadd.f32 %v227_v52, %v165_v47  ;;  %v45_v45 = vld [vmem:[%s523_s0 + $0xe8] sm:$0xff]  ;;  %v181_v47 = vmul.f32 %v44_v41, %v44_v41 }
  0x1c   :  { %v94_v58 = vadd.f32 %v93_v54, %v30_v49  ;;  %v229_v60 = vadd.f32 %v228_v56, %v166_v51  ;;  %v46_v49 = vld [vmem:[%s523_s0 + $0xf0] sm:$0xff]  ;;  %v182_v51 = vmul.f32 %v45_v45, %v45_v45 }
  0x1e   :  { %v95_v62 = vadd.f32 %v94_v58, %v31_v53  ;;  %v230_v0 = vadd.f32 %v229_v60, %v167_v55  ;;  %v47_v53 = vld [vmem:[%s523_s0 + $0xf8] sm:$0xff]  ;;  %v183_v55 = vmul.f32 %v46_v49, %v46_v49 }
  0x20   :  { %v96_v2 = vadd.f32 %v95_v62, %v32_v57  ;;  %v231_v4 = vadd.f32 %v230_v0, %v168_v59  ;;  %v48_v57 = vld [vmem:[%s523_s0 + $0x100] sm:$0xff]  ;;  %v184_v59 = vmul.f32 %v47_v53, %v47_v53 }
  0x22   :  { %v97_v6 = vadd.f32 %v96_v2, %v33_v61  ;;  %v232_v8 = vadd.f32 %v231_v4, %v169_v63  ;;  %v49_v61 = vld [vmem:[%s523_s0 + $0x108] sm:$0xff]  ;;  %v185_v63 = vmul.f32 %v48_v57, %v48_v57 }
  0x24   :  { %v98_v10 = vadd.f32 %v97_v6, %v34_v1  ;;  %v233_v12 = vadd.f32 %v232_v8, %v170_v3  ;;  %v50_v1 = vld [vmem:[%s523_s0 + $0x110] sm:$0xff]  ;;  %v186_v3 = vmul.f32 %v49_v61, %v49_v61 }
  0x26   :  { %v99_v14 = vadd.f32 %v98_v10, %v35_v5  ;;  %v234_v16 = vadd.f32 %v233_v12, %v171_v7  ;;  %v51_v5 = vld [vmem:[%s523_s0 + $0x118] sm:$0xff]  ;;  %v187_v7 = vmul.f32 %v50_v1, %v50_v1 }
  0x28   :  { %v100_v18 = vadd.f32 %v99_v14, %v36_v9  ;;  %v235_v20 = vadd.f32 %v234_v16, %v172_v11  ;;  %v52_v9 = vld [vmem:[%s523_s0 + $0x120] sm:$0xff]  ;;  %v188_v11 = vmul.f32 %v51_v5, %v51_v5 }
  0x2a   :  { %v101_v22 = vadd.f32 %v100_v18, %v37_v13  ;;  %v236_v24 = vadd.f32 %v235_v20, %v173_v15  ;;  %v53_v13 = vld [vmem:[%s523_s0 + $0x128] sm:$0xff]  ;;  %v189_v15 = vmul.f32 %v52_v9, %v52_v9 }
  0x2c   :  { %v102_v26 = vadd.f32 %v101_v22, %v38_v17  ;;  %v237_v28 = vadd.f32 %v236_v24, %v174_v19  ;;  %v54_v17 = vld [vmem:[%s523_s0 + $0x130] sm:$0xff]  ;;  %v190_v19 = vmul.f32 %v53_v13, %v53_v13 }
  0x2e   :  { %v103_v30 = vadd.f32 %v102_v26, %v39_v21  ;;  %v238_v32 = vadd.f32 %v237_v28, %v175_v23  ;;  %v55_v21 = vld [vmem:[%s523_s0 + $0x138] sm:$0xff]  ;;  %v191_v23 = vmul.f32 %v54_v17, %v54_v17 }
  0x30   :  { %v104_v34 = vadd.f32 %v103_v30, %v40_v25  ;;  %v239_v36 = vadd.f32 %v238_v32, %v176_v27  ;;  %v56_v25 = vld [vmem:[%s523_s0 + $0x140] sm:$0xff]  ;;  %v192_v27 = vmul.f32 %v55_v21, %v55_v21 }
  0x32   :  { %v105_v38 = vadd.f32 %v104_v34, %v41_v29  ;;  %v240_v40 = vadd.f32 %v239_v36, %v177_v31  ;;  %v57_v29 = vld [vmem:[%s523_s0 + $0x148] sm:$0xff]  ;;  %v193_v31 = vmul.f32 %v56_v25, %v56_v25 }
  0x34   :  { %v106_v42 = vadd.f32 %v105_v38, %v42_v33  ;;  %v241_v44 = vadd.f32 %v240_v40, %v178_v35  ;;  %v58_v33 = vld [vmem:[%s523_s0 + $0x150] sm:$0xff]  ;;  %v194_v35 = vmul.f32 %v57_v29, %v57_v29 }
  0x36   :  { %v107_v46 = vadd.f32 %v106_v42, %v43_v37  ;;  %v242_v48 = vadd.f32 %v241_v44, %v179_v39  ;;  %v59_v37 = vld [vmem:[%s523_s0 + $0x158] sm:$0xff]  ;;  %v195_v39 = vmul.f32 %v58_v33, %v58_v33 }
  0x38   :  { %v108_v50 = vadd.f32 %v107_v46, %v44_v41  ;;  %v243_v52 = vadd.f32 %v242_v48, %v180_v43  ;;  %v60_v41 = vld [vmem:[%s523_s0 + $0x160] sm:$0xff]  ;;  %v196_v43 = vmul.f32 %v59_v37, %v59_v37 }
  0x3a   :  { %v109_v54 = vadd.f32 %v108_v50, %v45_v45  ;;  %v244_v56 = vadd.f32 %v243_v52, %v181_v47  ;;  %v61_v45 = vld [vmem:[%s523_s0 + $0x168] sm:$0xff]  ;;  %v197_v47 = vmul.f32 %v60_v41, %v60_v41 }
  0x3c   :  { %v110_v58 = vadd.f32 %v109_v54, %v46_v49  ;;  %v245_v60 = vadd.f32 %v244_v56, %v182_v51  ;;  %v62_v49 = vld [vmem:[%s523_s0 + $0x170] sm:$0xff]  ;;  %v198_v51 = vmul.f32 %v61_v45, %v61_v45 }
  0x3e   :  { %v111_v62 = vadd.f32 %v110_v58, %v47_v53  ;;  %v246_v0 = vadd.f32 %v245_v60, %v183_v55  ;;  %v63_v53 = vld [vmem:[%s523_s0 + $0x178] sm:$0xff]  ;;  %v199_v55 = vmul.f32 %v62_v49, %v62_v49 }
  0x40   :  { %v112_v2 = vadd.f32 %v111_v62, %v48_v57  ;;  %v247_v4 = vadd.f32 %v246_v0, %v184_v59  ;;  %v64_v57 = vld [vmem:[%s523_s0 + $0x180] sm:$0xff]  ;;  %v200_v59 = vmul.f32 %v63_v53, %v63_v53 }
  0x42   :  { %v113_v6 = vadd.f32 %v112_v2, %v49_v61  ;;  %v248_v8 = vadd.f32 %v247_v4, %v185_v63  ;;  %v65_v61 = vld [vmem:[%s523_s0 + $0x188] sm:$0xff]  ;;  %v201_v63 = vmul.f32 %v64_v57, %v64_v57 }
  0x44   :  { %v114_v10 = vadd.f32 %v113_v6, %v50_v1  ;;  %v249_v12 = vadd.f32 %v248_v8, %v186_v3  ;;  %v66_v1 = vld [vmem:[%s523_s0 + $0x190] sm:$0xff]  ;;  %v202_v3 = vmul.f32 %v65_v61, %v65_v61 }
  0x46   :  { %v115_v14 = vadd.f32 %v114_v10, %v51_v5  ;;  %v250_v16 = vadd.f32 %v249_v12, %v187_v7  ;;  %v67_v5 = vld [vmem:[%s523_s0 + $0x198] sm:$0xff]  ;;  %v203_v7 = vmul.f32 %v66_v1, %v66_v1 }
  0x48   :  { %v116_v18 = vadd.f32 %v115_v14, %v52_v9  ;;  %v251_v20 = vadd.f32 %v250_v16, %v188_v11  ;;  %v68_v9 = vld [vmem:[%s523_s0 + $0x1a0] sm:$0xff]  ;;  %v204_v11 = vmul.f32 %v67_v5, %v67_v5 }
  0x4a   :  { %v117_v22 = vadd.f32 %v116_v18, %v53_v13  ;;  %v252_v24 = vadd.f32 %v251_v20, %v189_v15  ;;  %v69_v13 = vld [vmem:[%s523_s0 + $0x1a8] sm:$0xff]  ;;  %v205_v15 = vmul.f32 %v68_v9, %v68_v9 }
  0x4c   :  { %v118_v26 = vadd.f32 %v117_v22, %v54_v17  ;;  %v253_v28 = vadd.f32 %v252_v24, %v190_v19  ;;  %v70_v17 = vld [vmem:[%s523_s0 + $0x1b0] sm:$0xff]  ;;  %v206_v19 = vmul.f32 %v69_v13, %v69_v13 }
  0x4e   :  { %v119_v30 = vadd.f32 %v118_v26, %v55_v21  ;;  %v254_v32 = vadd.f32 %v253_v28, %v191_v23  ;;  %v71_v21 = vld [vmem:[%s523_s0 + $0x1b8] sm:$0xff]  ;;  %v207_v23 = vmul.f32 %v70_v17, %v70_v17 }
  0x50   :  { %v120_v34 = vadd.f32 %v119_v30, %v56_v25  ;;  %v255_v36 = vadd.f32 %v254_v32, %v192_v27  ;;  %v72_v25 = vld [vmem:[%s523_s0 + $0x1c0] sm:$0xff]  ;;  %v208_v27 = vmul.f32 %v71_v21, %v71_v21 }
  0x52   :  { %v121_v38 = vadd.f32 %v120_v34, %v57_v29  ;;  %v256_v40 = vadd.f32 %v255_v36, %v193_v31  ;;  %v73_v29 = vld [vmem:[%s523_s0 + $0x1c8] sm:$0xff]  ;;  %v209_v31 = vmul.f32 %v72_v25, %v72_v25 }
  0x54   :  { %v122_v42 = vadd.f32 %v121_v38, %v58_v33  ;;  %v257_v44 = vadd.f32 %v256_v40, %v194_v35  ;;  %v74_v33 = vld [vmem:[%s523_s0 + $0x1d0] sm:$0xff]  ;;  %v210_v35 = vmul.f32 %v73_v29, %v73_v29 }
  0x56   :  { %v123_v46 = vadd.f32 %v122_v42, %v59_v37  ;;  %v258_v48 = vadd.f32 %v257_v44, %v195_v39  ;;  %v75_v37 = vld [vmem:[%s523_s0 + $0x1d8] sm:$0xff]  ;;  %v211_v39 = vmul.f32 %v74_v33, %v74_v33 }
  0x58   :  { %v124_v50 = vadd.f32 %v123_v46, %v60_v41  ;;  %v259_v52 = vadd.f32 %v258_v48, %v196_v43  ;;  %v76_v41 = vld [vmem:[%s523_s0 + $0x1e0] sm:$0xff]  ;;  %v212_v43 = vmul.f32 %v75_v37, %v75_v37 }
  0x5a   :  { %v125_v54 = vadd.f32 %v124_v50, %v61_v45  ;;  %v260_v56 = vadd.f32 %v259_v52, %v197_v47  ;;  %v77_v45 = vld [vmem:[%s523_s0 + $0x1e8] sm:$0xff]  ;;  %v213_v47 = vmul.f32 %v76_v41, %v76_v41 }
  0x5c   :  { %v126_v58 = vadd.f32 %v125_v54, %v62_v49  ;;  %v261_v60 = vadd.f32 %v260_v56, %v198_v51  ;;  %v78_v49 = vld [vmem:[%s523_s0 + $0x1f0] sm:$0xff]  ;;  %v214_v51 = vmul.f32 %v77_v45, %v77_v45 }
  0x5e   :  { %v127_v62 = vadd.f32 %v126_v58, %v63_v53  ;;  %v262_v0 = vadd.f32 %v261_v60, %v199_v55  ;;  %v79_v53 = vld [vmem:[%s523_s0 + $0x1f8] sm:$0xff]  ;;  %v215_v55 = vmul.f32 %v78_v49, %v78_v49 }
  0x5f   :  { %v216_v58 = vmul.f32 %v79_v53, %v79_v53 }
  0x60   :  { %v128_v2 = vadd.f32 %v127_v62, %v64_v57  ;;  %v263_v4 = vadd.f32 %v262_v0, %v200_v59 }
  0x62   :  { %v129_v6 = vadd.f32 %v128_v2, %v65_v61  ;;  %v264_v8 = vadd.f32 %v263_v4, %v201_v63 }
  0x64   :  { %v130_v10 = vadd.f32 %v129_v6, %v66_v1  ;;  %v265_v12 = vadd.f32 %v264_v8, %v202_v3 }
  0x66   :  { %v131_v14 = vadd.f32 %v130_v10, %v67_v5  ;;  %v266_v16 = vadd.f32 %v265_v12, %v203_v7  ;;  %v80_v7 = vld [vmem:[%s524_s1] sm:$0x1] }
  0x67   :  { %v152_v12 = vld [vmem:[%s525_s2] sm:$0x1] }
  0x68   :  { %v132_v18 = vadd.f32 %v131_v14, %v68_v9  ;;  %v267_v20 = vadd.f32 %v266_v16, %v204_v11 }
  0x6a   :  { %v133_v22 = vadd.f32 %v132_v18, %v69_v13  ;;  %v268_v24 = vadd.f32 %v267_v20, %v205_v15 }
  0x6c   :  { %v134_v26 = vadd.f32 %v133_v22, %v70_v17  ;;  %v269_v28 = vadd.f32 %v268_v24, %v206_v19 }
  0x6e   :  { %v135_v30 = vadd.f32 %v134_v26, %v71_v21  ;;  %v270_v32 = vadd.f32 %v269_v28, %v207_v23 }
  0x70   :  { %v136_v34 = vadd.f32 %v135_v30, %v72_v25  ;;  %v271_v36 = vadd.f32 %v270_v32, %v208_v27 }
  0x72   :  { %v137_v38 = vadd.f32 %v136_v34, %v73_v29  ;;  %v272_v40 = vadd.f32 %v271_v36, %v209_v31 }
  0x74   :  { %v138_v42 = vadd.f32 %v137_v38, %v74_v33  ;;  %v273_v44 = vadd.f32 %v272_v40, %v210_v35 }
  0x76   :  { %v139_v46 = vadd.f32 %v138_v42, %v75_v37  ;;  %v274_v48 = vadd.f32 %v273_v44, %v211_v39 }
  0x78   :  { %v140_v50 = vadd.f32 %v139_v46, %v76_v41  ;;  %v275_v52 = vadd.f32 %v274_v48, %v212_v43 }
  0x7a   :  { %v141_v54 = vadd.f32 %v140_v50, %v77_v45  ;;  %v276_v56 = vadd.f32 %v275_v52, %v213_v47 }
  0x7c   :  { %v142_v57 = vadd.f32 %v141_v54, %v78_v49  ;;  %v277_v59 = vadd.f32 %v276_v56, %v214_v51 }
  0x7e   :  { %v143_v60 = vadd.f32 %v142_v57, %v79_v53  ;;  %v278_v61 = vadd.f32 %v277_v59, %v215_v55 }
  0x80   :  { %v144_v62 = vrot.slane %v143_v60, 4  ;;  %v279_v63 = vadd.f32 %v278_v61, %v216_v58 }
  0x82   :  { %v145_v0 = vadd.f32 %v144_v62, %v143_v60  ;;  %v280_v1 = vrot.slane %v279_v63, 4 }
  0x84   :  { %v146_v2 = vrot.slane %v145_v0, 2  ;;  %v281_v3 = vadd.f32 %v280_v1, %v279_v63 }
  0x86   :  { %v147_v4 = vadd.f32 %v146_v2, %v145_v0  ;;  %v282_v5 = vrot.slane %v281_v3, 2 }
  0x88   :  { %v148_v6 = vrot.slane %v147_v4, 1  ;;  %v283_v8 = vadd.f32 %v282_v5, %v281_v3 }
  0x8a   :  { %v149_v9 = vadd.f32 %v148_v6, %v147_v4  ;;  %v284_v10 = vrot.slane %v283_v8, 1 }
  0x8c   :  { %v150_v11 = vadd.f32 %v149_v9, %v80_v7  ;;  %v285_v13 = vadd.f32 %v284_v10, %v283_v8 }
  0x8e   :  { %151 = vst [vmem:[%s524_s1] sm:$0x1] %v150_v11  ;;  %v286_v14 = vadd.f32 %v285_v13, %v152_v12 }
  0x90   :  { %287 = vst [vmem:[%s525_s2] sm:$0x1] %v286_v14 }

// kernel: scale_prediction_forward.5
= control target key start
LH: loop header
LB: loop body
LE: loop exit
PB: predicated region body
PF: predicated region fallthrough
CT: control target
= control target key end

     0   :  { %s1362_s18 = smov 0   ;;  %s1364_s19 = smov 0   ;;  %s1620_s0 = inlined_call_operand.vmem [shape: f32[512,128], index: 0, kind: input, shape index: {}]   ;;  %s1621_s1 = inlined_call_operand.vmem [shape: f32[1,128], index: 1, kind: input, shape index: {}]   ;;  %s1622_s2 = inlined_call_operand.vmem [shape: f32[1,128], index: 2, kind: input, shape index: {}]   ;;  %s1623_s3 = inlined_call_operand.vmem [shape: bf16[128,128], index: 3, kind: input, shape index: {}]   ;;  %s1624_s4 = inlined_call_operand.vmem [shape: f32[1,128], index: 4, kind: input, shape index: {}]   ;;  %s1625_s5 = inlined_call_operand.vmem [shape: f32[512,128], index: 5, kind: output, shape index: {}]  }
   0x1   :  { %s1366_s20 = smov 0  }
   0x2 LB: > { %s34_s21 = sadd.s32 1, %s1326_s19  ;;  %p1170_p0 = scmp.ge.s32.totalorder %s1330_s20, 1  ;;  %s1330_s20 = sphi %s1366_s20, %s15_s20   ;;  %s1326_s19 = sphi %s1364_s19, %s1627_s19   ;;  %s1322_s18 = sphi %s1362_s18, %s1626_s18  }
   0x3   : > { %p36_p1 = scmp.ge.s32.totalorder %s34_s21, 2  ;;  %p254_p2 = scmp.lt.s32.totalorder %s1330_s20, 3 }
   0x5   : > { %s1629_s21 = smov (%p36_p1, %s34_s21), 0  ;;  %p255_p3 = pnand %p1170_p0, %p254_p2 }
   0x6   : > { %v1300_v0 = vld [vmem:[%s1623_s3] sm:$0xff] (!%p255_p3)   ;;  %s1171_s24 = sshll.u32 (!%p255_p3), %s1322_s18, 5  ;;  %v1301_v1 = vld [vmem:[%s1623_s3 + $0x8] sm:$0xff] (!%p255_p3)   ;;  %v1302_v2 = vld [vmem:[%s1623_s3 + $0x10] sm:$0xff] (!%p255_p3)  }
   0x7   : > { %258 = sbr.rel (%p255_p3) target bundleno = 286 (0x11e), region = 40  ;;  %p306_p4 = scmp.lt.s32.totalorder (!%p255_p3), %s1171_s24, 63  ;;  %1212 = vmatprep.subr.bf16.mxu0 (!%p255_p3), %v1300_v0  ;;  %1260 = vmatprep.subr.bf16.mxu1 (!%p255_p3), %v1300_v0  ;;  %v1303_v3 = vld [vmem:[%s1623_s3 + $0x18] sm:$0xff] (!%p255_p3)   ;;  %v1407_v6 = vld [vmem:[%s1621_s1] ss:$0 sm:$0xff] (!%p255_p3)  ;;  %v1305_v34 = vld [vmem:[%s1623_s3 + $0x28] sm:$0xff] (!%p255_p3)  }
   0x8   : > { %1213 = vmatpush3.bf16.msra.mxu0 (!%p255_p3), %v1300_v0  ;;  %1268 = vmatpush3.bf16.msra.mxu1 (!%p255_p3), %v1300_v0  ;;  %v1414_v9 = vld [vmem:[%s1622_s2] ss:$0 sm:$0xff] (!%p255_p3)  ;;  %v1306_v50 = vld [vmem:[%s1623_s3 + $0x30] sm:$0xff] (!%p255_p3)   ;;  %v1307_v63 = vld [vmem:[%s1623_s3 + $0x38] sm:$0xff] (!%p255_p3)  }
   0x9   : > { %1214 = vmatprep.subr.bf16.mxu0 (!%p255_p3), %v1301_v1  ;;  %1261 = vmatprep.subr.bf16.mxu1 (!%p255_p3), %v1301_v1  ;;  %v1304_v19 = vld [vmem:[%s1623_s3 + $0x20] sm:$0xff] (!%p255_p3)  }
   0xc   : > { %1215 = vmatpush3.bf16.msra.mxu0 (!%p255_p3), %v1301_v1  ;;  %1269 = vmatpush3.bf16.msra.mxu1 (!%p255_p3), %v1301_v1 }
   0xd   : > { %1216 = vmatprep.subr.bf16.mxu0 (!%p255_p3), %v1302_v2  ;;  %1262 = vmatprep.subr.bf16.mxu1 (!%p255_p3), %v1302_v2 }
   0xe   : > { %s1631_s24 = smov (!%p306_p4, %s1171_s24), 63 }
   0xf   : > { %s1172_s29 = sshll.u32 %s1631_s24, 3 }
  0x10   : > { %s1397_s7 = scalar_lea.vmem %s1620_s0, %s1172_s29  ;;  %1217 = vmatpush3.bf16.msra.mxu0 %v1302_v2  ;;  %1270 = vmatpush3.bf16.msra.mxu1 %v1302_v2  ;;  %s1545_s6 = scalar_lea.vmem %s1625_s5, %s1172_s29 }
  0x11   : > { %v378_v4 = vld [vmem:[%s1397_s7] sm:$0xff]  ;;  %v379_v5 = vld [vmem:[%s1397_s7 + $0x8] sm:$0xff]  ;;  %v380_v14 = vld [vmem:[%s1397_s7 + $0x10] sm:$0xff]  ;;  %1218 = vmatprep.subr.bf16.mxu0 %v1303_v3  ;;  %1263 = vmatprep.subr.bf16.mxu1 %v1303_v3 }
  0x12   : > { %v417_v7 = vmul.f32 %v1407_v6, %v378_v4  ;;  %v418_v8 = vmul.f32 %v1407_v6, %v379_v5  ;;  %v394_v10 = vld [vmem:[%s1397_s7 + $0x80] sm:$0xff]  ;;  %v395_v11 = vld [vmem:[%s1397_s7 + $0x88] sm:$0xff]  ;;  %v381_v15 = vld [vmem:[%s1397_s7 + $0x18] sm:$0xff]  ;;  %v419_v18 = vmul.f32 %v1407_v6, %v380_v14 }
  0x13   : > { %v433_v12 = vmul.f32 %v1407_v6, %v394_v10  ;;  %v434_v13 = vmul.f32 %v1407_v6, %v395_v11  ;;  %v420_v22 = vmul.f32 %v1407_v6, %v381_v15  ;;  %v396_v25 = vld [vmem:[%s1397_s7 + $0x90] sm:$0xff]  ;;  %v397_v31 = vld [vmem:[%s1397_s7 + $0x98] sm:$0xff]  ;;  %v382_v32 = vld [vmem:[%s1397_s7 + $0x20] sm:$0xff] }
  0x14   : > { %v456_v16 = vadd.f32 %v1414_v9, %v417_v7  ;;  %v457_v17 = vadd.f32 %v1414_v9, %v418_v8  ;;  %1219 = vmatpush3.bf16.msra.mxu0 %v1303_v3  ;;  %1271 = vmatpush3.bf16.msra.mxu1 %v1303_v3  ;;  %v458_v30 = vadd.f32 %v1414_v9, %v419_v18  ;;  %v383_v33 = vld [vmem:[%s1397_s7 + $0x28] sm:$0xff]  ;;  %v398_v38 = vld [vmem:[%s1397_s7 + $0xa0] sm:$0xff]  ;;  %v384_v60 = vld [vmem:[%s1397_s7 + $0x30] sm:$0xff] }
  0x15   : > { %v472_v20 = vadd.f32 %v1414_v9, %v433_v12  ;;  %v473_v21 = vadd.f32 %v1414_v9, %v434_v13  ;;  %1220 = vmatprep.subr.bf16.mxu0 %v1304_v19  ;;  %1264 = vmatprep.subr.bf16.mxu1 %v1304_v19  ;;  %v459_v40 = vadd.f32 %v1414_v9, %v420_v22  ;;  %v399_v46 = vld [vmem:[%s1397_s7 + $0xa8] sm:$0xff]  ;;  %v385_v3 = vld [vmem:[%s1397_s7 + $0x38] sm:$0xff]  ;;  %v400_v10 = vld [vmem:[%s1397_s7 + $0xb0] sm:$0xff] }
  0x16   : > { %vm488_vm0 = vcmp.gt.f32.partialorder %v456_v16, 0.0  ;;  %vm489_vm1 = vcmp.gt.f32.partialorder %v457_v17, 0.0  ;;  %v520_v23 = vmul.f32 0.1, %v456_v16  ;;  %v521_v24 = vmul.f32 0.1, %v457_v17 }
  0x17   : > { %vm504_vm2 = vcmp.gt.f32.partialorder %v472_v20, 0.0  ;;  %vm505_vm3 = vcmp.gt.f32.partialorder %v473_v21, 0.0  ;;  %v536_v26 = vmul.f32 0.1, %v472_v20  ;;  %v537_v27 = vmul.f32 0.1, %v473_v21 }
  0x18   : > { %v552_v28 = vsel %vm488_vm0, %v456_v16, %v520_v23  ;;  %v553_v29 = vsel %vm489_vm1, %v457_v17, %v521_v24  ;;  %vm490_vm4 = vcmp.gt.f32.partialorder %v458_v30, 0.0  ;;  %v522_v41 = vmul.f32 0.1, %v458_v30  ;;  %1221 = vmatpush3.bf16.msra.mxu0 %v1304_v19  ;;  %1272 = vmatpush3.bf16.msra.mxu1 %v1304_v19  ;;  %v401_v14 = vld [vmem:[%s1397_s7 + $0xb8] sm:$0xff]  ;;  %v386_v15 = vld [vmem:[%s1397_s7 + $0x40] sm:$0xff]  ;;  %v387_v19 = vld [vmem:[%s1397_s7 + $0x48] sm:$0xff] }
  0x19   : > { %v616_v35 = vpack.c.bf16 %v553_v29, %v552_v28  ;;  %v568_v36 = vsel %vm504_vm2, %v472_v20, %v536_v26  ;;  %v569_v37 = vsel %vm505_vm3, %v473_v21, %v537_v27  ;;  %v435_v42 = vmul.f32 %v1407_v6, %v396_v25  ;;  %1222 = vmatprep.subr.bf16.mxu0 %v1305_v34 }
  0x1a   : > { %v624_v39 = vpack.c.bf16 %v569_v37, %v568_v36  ;;  %v436_v43 = vmul.f32 %v1407_v6, %v397_v31  ;;  %v421_v44 = vmul.f32 %v1407_v6, %v382_v32  ;;  %v422_v45 = vmul.f32 %v1407_v6, %v383_v33  ;;  %1265 = vmatprep.subr.bf16.mxu1 %v1305_v34  ;;  %v402_v36 = vld [vmem:[%s1397_s7 + $0xc0] sm:$0xff]  ;;  %v403_v37 = vld [vmem:[%s1397_s7 + $0xc8] sm:$0xff] }
  0x1b   : > { %1228 = vmatprep.mubr.bf16.mxu0 %v616_v35  ;;  %vm491_vm5 = vcmp.gt.f32.partialorder %v459_v40, 0.0  ;;  %v523_v47 = vmul.f32 0.1, %v459_v40  ;;  %v1448_v48 = vsel %vm490_vm4, %v458_v30, %v522_v41  ;;  %v437_v49 = vmul.f32 %v1407_v6, %v398_v38  ;;  %v389_v41 = vld [vmem:[%s1397_s7 + $0x58] sm:$0xff] }
  0x1c   : > { %v474_v51 = vadd.f32 %v1414_v9, %v435_v42  ;;  %v475_v52 = vadd.f32 %v1414_v9, %v436_v43  ;;  %v460_v53 = vadd.f32 %v1414_v9, %v421_v44  ;;  %1244 = vmatprep.mubr.bf16.mxu1 %v624_v39  ;;  %v461_v55 = vadd.f32 %v1414_v9, %v422_v45  ;;  %v404_v45 = vld [vmem:[%s1397_s7 + $0xd0] sm:$0xff] }
  0x1d   : > { %v1457_v54 = vsel %vm491_vm5, %v459_v40, %v523_v47  ;;  %v438_v56 = vmul.f32 %v1407_v6, %v399_v46  ;;  %v476_v57 = vadd.f32 %v1414_v9, %v437_v49  ;;  %1223 = vmatpush3.bf16.msra.mxu0 %v1305_v34  ;;  %1273 = vmatpush3.bf16.msra.mxu1 %v1305_v34  ;;  %v388_v40 = vld [vmem:[%s1397_s7 + $0x50] sm:$0xff] }
  0x1e   : > { %v617_v58 = vpack.c.bf16 %v1457_v54, %v1448_v48  ;;  %vm506_vm6 = vcmp.gt.f32.partialorder %v474_v51, 0.0  ;;  %vm507_vm7 = vcmp.gt.f32.partialorder %v475_v52, 0.0  ;;  %v538_v59 = vmul.f32 0.1, %v474_v51  ;;  %1224 = vmatprep.subr.bf16.mxu0 %v1306_v50  ;;  %1266 = vmatprep.subr.bf16.mxu1 %v1306_v50 }
  0x1f   : > { %v539_v61 = vmul.f32 0.1, %v475_v52  ;;  %vm492_vm8 = vcmp.gt.f32.partialorder %v460_v53, 0.0  ;;  %vm493_vm9 = vcmp.gt.f32.partialorder %v461_v55, 0.0  ;;  %v524_v62 = vmul.f32 0.1, %v460_v53 }
  0x20   : > { %v570_v0 = vsel %vm506_vm6, %v474_v51, %v538_v59  ;;  %v525_v1 = vmul.f32 0.1, %v461_v55  ;;  %v477_v2 = vadd.f32 %v1414_v9, %v438_v56  ;;  %vm508_vm10 = vcmp.gt.f32.partialorder %v476_v57, 0.0  ;;  %v405_v51 = vld [vmem:[%s1397_s7 + $0xd8] sm:$0xff] }
  0x21   : > { %v571_v4 = vsel %vm507_vm7, %v475_v52, %v539_v61  ;;  %v556_v5 = vsel %vm492_vm8, %v460_v53, %v524_v62  ;;  %v540_v7 = vmul.f32 0.1, %v476_v57  ;;  %v423_v8 = vmul.f32 %v1407_v6, %v384_v60  ;;  %1225 = vmatpush3.bf16.msra.mxu0 %v1306_v50  ;;  %1274 = vmatpush3.bf16.msra.mxu1 %v1306_v50 }
  0x22   : > { %v625_v11 = vpack.c.bf16 %v571_v4, %v570_v0  ;;  %v557_v12 = vsel %vm493_vm9, %v461_v55, %v525_v1  ;;  %vm509_vm11 = vcmp.gt.f32.partialorder %v477_v2, 0.0  ;;  %v541_v13 = vmul.f32 0.1, %v477_v2  ;;  %1226 = vmatprep.subr.bf16.mxu0 %v1307_v63  ;;  %1267 = vmatprep.subr.bf16.mxu1 %v1307_v63 }
  0x23   : > { %v618_v16 = vpack.c.bf16 %v557_v12, %v556_v5  ;;  %v572_v17 = vsel %vm508_vm10, %v476_v57, %v540_v7  ;;  %v424_v18 = vmul.f32 %v1407_v6, %v385_v3  ;;  %v462_v21 = vadd.f32 %v1414_v9, %v423_v8  ;;  %v390_v8 = vld [vmem:[%s1397_s7 + $0x60] sm:$0xff] }
  0x24   : > { %v573_v20 = vsel %vm509_vm11, %v477_v2, %v541_v13  ;;  %v439_v22 = vmul.f32 %v1407_v6, %v400_v10  ;;  %v440_v25 = vmul.f32 %v1407_v6, %v401_v14  ;;  %v425_v26 = vmul.f32 %v1407_v6, %v386_v15  ;;  %v391_v10 = vld [vmem:[%s1397_s7 + $0x68] sm:$0xff] }
  0x25   : > { %v626_v23 = vpack.c.bf16 %v573_v20, %v572_v17  ;;  %v463_v24 = vadd.f32 %v1414_v9, %v424_v18  ;;  %vm494_vm12 = vcmp.gt.f32.partialorder %v462_v21, 0.0  ;;  %v526_v27 = vmul.f32 0.1, %v462_v21  ;;  %1227 = vmatpush3.bf16.msra.mxu0 %v1307_v63  ;;  %1275 = vmatpush3.bf16.msra.mxu1 %v1307_v63  ;;  %v407_v15 = vld [vmem:[%s1397_s7 + $0xe8] sm:$0xff]  ;;  %v393_v17 = vld [vmem:[%s1397_s7 + $0x78] sm:$0xff] }
  0x26   : > { %v478_v28 = vadd.f32 %v1414_v9, %v439_v22  ;;  %v426_v29 = vmul.f32 %v1407_v6, %v387_v19  ;;  %v479_v31 = vadd.f32 %v1414_v9, %v440_v25  ;;  %v464_v32 = vadd.f32 %v1414_v9, %v425_v26 }
  0x27   : > { %vm495_vm13 = vcmp.gt.f32.partialorder %v463_v24, 0.0  ;;  %v527_v30 = vmul.f32 0.1, %v463_v24  ;;  %v558_v33 = vsel %vm494_vm12, %v462_v21, %v526_v27  ;;  %v441_v49 = vmul.f32 %v1407_v6, %v402_v36  ;;  %v408_v36 = vld [vmem:[%s1397_s7 + $0xf0] sm:$0xff] }
  0x28   : > { %vm510_vm14 = vcmp.gt.f32.partialorder %v478_v28, 0.0  ;;  %v542_v34 = vmul.f32 0.1, %v478_v28  ;;  %v465_v35 = vadd.f32 %v1414_v9, %v426_v29  ;;  %vm511_vm15 = vcmp.gt.f32.partialorder %v479_v31, 0.0  ;;  %1229 = vmatmul.mubr.bf16.vlgmr.msra.gmra.mrb[0].mxu0 %v617_v58  ;;  %1245 = vmatmul.mubr.bf16.vlgmr.msra.gmra.mrb[0].mxu1 %v625_v11  ;;  %v406_v11 = vld [vmem:[%s1397_s7 + $0xe0] sm:$0xff] }
  0x29   : > { %v559_v38 = vsel %vm495_vm13, %v463_v24, %v527_v30  ;;  %v543_v39 = vmul.f32 0.1, %v479_v31  ;;  %vm496_vm0 = vcmp.gt.f32.partialorder %v464_v32, 0.0  ;;  %v528_v44 = vmul.f32 0.1, %v464_v32  ;;  %1232 = vmatprep.mubr.bf16.mxu0 %v618_v16  ;;  %1248 = vmatprep.mubr.bf16.mxu1 %v626_v23  ;;  %v392_v16 = vld [vmem:[%s1397_s7 + $0x70] sm:$0xff] }
  0x2a   : > { %v619_v42 = vpack.c.bf16 %v559_v38, %v558_v33  ;;  %v574_v43 = vsel %vm510_vm14, %v478_v28, %v542_v34  ;;  %vm497_vm1 = vcmp.gt.f32.partialorder %v465_v35, 0.0  ;;  %v529_v47 = vmul.f32 0.1, %v465_v35 }
  0x2b   : > { %v575_v46 = vsel %vm511_vm15, %v479_v31, %v543_v39  ;;  %v442_v50 = vmul.f32 %v1407_v6, %v403_v37  ;;  %v560_v53 = vsel %vm496_vm0, %v464_v32, %v528_v44  ;;  %v427_v48 = vmul.f32 %v1407_v6, %v388_v40  ;;  %v409_v37 = vld [vmem:[%s1397_s7 + $0xf8] sm:$0xff] }
  0x2c   : > { %v627_v52 = vpack.c.bf16 %v575_v46, %v574_v43  ;;  %v428_v54 = vmul.f32 %v1407_v6, %v389_v41  ;;  %v561_v55 = vsel %vm497_vm1, %v465_v35, %v529_v47  ;;  %v480_v56 = vadd.f32 %v1414_v9, %v441_v49 }
  0x2d   : > { %v481_v57 = vadd.f32 %v1414_v9, %v442_v50  ;;  %v443_v58 = vmul.f32 %v1407_v6, %v404_v45  ;;  %v620_v59 = vpack.c.bf16 %v561_v55, %v560_v53  ;;  %v466_v60 = vadd.f32 %v1414_v9, %v427_v48 }
  0x2e   : > { %v467_v61 = vadd.f32 %v1414_v9, %v428_v54  ;;  %v444_v62 = vmul.f32 %v1407_v6, %v405_v51  ;;  %vm512_vm2 = vcmp.gt.f32.partialorder %v480_v56, 0.0  ;;  %v544_v63 = vmul.f32 0.1, %v480_v56 }
  0x2f   : > { %vm513_vm3 = vcmp.gt.f32.partialorder %v481_v57, 0.0  ;;  %v545_v0 = vmul.f32 0.1, %v481_v57  ;;  %vm498_vm4 = vcmp.gt.f32.partialorder %v466_v60, 0.0  ;;  %v530_v1 = vmul.f32 0.1, %v466_v60 }
  0x30   : > { %vm499_vm5 = vcmp.gt.f32.partialorder %v467_v61, 0.0  ;;  %v531_v2 = vmul.f32 0.1, %v467_v61  ;;  %v576_v3 = vsel %vm512_vm2, %v480_v56, %v544_v63  ;;  %v482_v5 = vadd.f32 %v1414_v9, %v443_v58  ;;  %1233 = vmatmul.mubr.bf16.gmra.mrb[4].mxu0 %v619_v42  ;;  %1249 = vmatmul.mubr.bf16.gmra.mrb[4].mxu1 %v627_v52 }
  0x31   : > { %v577_v4 = vsel %vm513_vm3, %v481_v57, %v545_v0  ;;  %v483_v7 = vadd.f32 %v1414_v9, %v444_v62  ;;  %v562_v13 = vsel %vm498_vm4, %v466_v60, %v530_v1  ;;  %1236 = vmatprep.mubr.bf16.mxu0 %v620_v59  ;;  %v429_v21 = vmul.f32 %v1407_v6, %v390_v8 }
  0x32   : > { %v628_v12 = vpack.c.bf16 %v577_v4, %v576_v3  ;;  %v563_v14 = vsel %vm499_vm5, %v467_v61, %v531_v2  ;;  %vm514_vm6 = vcmp.gt.f32.partialorder %v482_v5, 0.0  ;;  %v546_v19 = vmul.f32 0.1, %v482_v5 }
  0x33   : > { %v621_v18 = vpack.c.bf16 %v563_v14, %v562_v13  ;;  %vm515_vm7 = vcmp.gt.f32.partialorder %v483_v7, 0.0  ;;  %v547_v20 = vmul.f32 0.1, %v483_v7  ;;  %v430_v22 = vmul.f32 %v1407_v6, %v391_v10 }
  0x34   : > { %1252 = vmatprep.mubr.bf16.mxu1 %v628_v12  ;;  %v445_v23 = vmul.f32 %v1407_v6, %v406_v11  ;;  %v578_v24 = vsel %vm514_vm6, %v482_v5, %v546_v19  ;;  %v446_v25 = vmul.f32 %v1407_v6, %v407_v15  ;;  %v431_v26 = vmul.f32 %v1407_v6, %v392_v16 }
  0x35   : > { %v432_v27 = vmul.f32 %v1407_v6, %v393_v17  ;;  %v579_v28 = vsel %vm515_vm7, %v483_v7, %v547_v20  ;;  %v468_v29 = vadd.f32 %v1414_v9, %v429_v21  ;;  %v469_v30 = vadd.f32 %v1414_v9, %v430_v22 }
  0x36   : > { %v484_v31 = vadd.f32 %v1414_v9, %v445_v23  ;;  %v629_v32 = vpack.c.bf16 %v579_v28, %v578_v24  ;;  %v485_v33 = vadd.f32 %v1414_v9, %v446_v25  ;;  %v470_v34 = vadd.f32 %v1414_v9, %v431_v26 }
  0x37   : > { %v471_v35 = vadd.f32 %v1414_v9, %v432_v27  ;;  %vm500_vm8 = vcmp.gt.f32.partialorder %v468_v29, 0.0  ;;  %vm501_vm9 = vcmp.gt.f32.partialorder %v469_v30, 0.0  ;;  %v532_v38 = vmul.f32 0.1, %v468_v29 }
  0x38   : > { %v533_v39 = vmul.f32 0.1, %v469_v30  ;;  %vm516_vm10 = vcmp.gt.f32.partialorder %v484_v31, 0.0  ;;  %vm517_vm11 = vcmp.gt.f32.partialorder %v485_v33, 0.0  ;;  %v548_v40 = vmul.f32 0.1, %v484_v31  ;;  %1237 = vmatmul.mubr.bf16.gmra.mrb[8].mxu0 %v621_v18  ;;  %1253 = vmatmul.mubr.bf16.gmra.mrb[8].mxu1 %v629_v32 }
  0x39   : > { %v549_v41 = vmul.f32 0.1, %v485_v33  ;;  %v564_v42 = vsel %vm500_vm8, %v468_v29, %v532_v38  ;;  %vm502_vm12 = vcmp.gt.f32.partialorder %v470_v34, 0.0  ;;  %vm503_vm13 = vcmp.gt.f32.partialorder %v471_v35, 0.0 }
  0x3a   : > { %v565_v43 = vsel %vm501_vm9, %v469_v30, %v533_v39  ;;  %v580_v45 = vsel %vm516_vm10, %v484_v31, %v548_v40  ;;  %v534_v47 = vmul.f32 0.1, %v470_v34  ;;  %v535_v50 = vmul.f32 0.1, %v471_v35 }
  0x3b   : > { %v622_v44 = vpack.c.bf16 %v565_v43, %v564_v42  ;;  %v581_v46 = vsel %vm517_vm11, %v485_v33, %v549_v41  ;;  %v447_v51 = vmul.f32 %v1407_v6, %v408_v36  ;;  %v448_v52 = vmul.f32 %v1407_v6, %v409_v37  ;;  %v1538_v6 = vld [vmem:[%s1624_s4] ss:$0 sm:$0xff] }
  0x3c   : > { %v630_v49 = vpack.c.bf16 %v581_v46, %v580_v45  ;;  %v566_v53 = vsel %vm502_vm12, %v470_v34, %v534_v47  ;;  %v567_v48 = vsel %vm503_vm13, %v471_v35, %v535_v50 }
  0x3d   : > { %1240 = vmatprep.mubr.bf16.mxu0 %v622_v44  ;;  %v486_v54 = vadd.f32 %v1414_v9, %v447_v51  ;;  %v487_v55 = vadd.f32 %v1414_v9, %v448_v52  ;;  %v623_v56 = vpack.c.bf16 %v567_v48, %v566_v53 }
  0x3e   : > { %1256 = vmatprep.mubr.bf16.mxu1 %v630_v49 }
  0x3f   : > { %vm518_vm14 = vcmp.gt.f32.partialorder %v486_v54, 0.0  ;;  %vm519_vm15 = vcmp.gt.f32.partialorder %v487_v55, 0.0  ;;  %v550_v57 = vmul.f32 0.1, %v486_v54  ;;  %v551_v58 = vmul.f32 0.1, %v487_v55 }
  0x40   : > { %1241 = vmatmul.mubr.bf16.gmra.mrb[12].mxu0 %v623_v56 }
  0x41   : > { %v582_v59 = vsel %vm518_vm14, %v486_v54, %v550_v57  ;;  %v583_v60 = vsel %vm519_vm15, %v487_v55, %v551_v58 }
  0x42   : > { %v631_v61 = vpack.c.bf16 %v583_v60, %v582_v59 }
  0x44   : > { %1257 = vmatmul.mubr.bf16.gmra.mrb[12].mxu1 %v631_v61 }
  0xfb   : > { %v1230_v9 = vpop.f32.mrb[0].mxu0  ;;  %v1246_v62 = vpop.f32.mrb[0].mxu1 }
  0xfc   : > { %v965_v63 = vadd.f32 %v1230_v9, %v1538_v6  ;;  %v981_v0 = vadd.f32 %v1246_v62, %v1538_v6  ;;  %v730_v1 = vpop.f32.mrb[1].mxu0  ;;  %v794_v2 = vpop.f32.mrb[1].mxu1 }
  0xfd   : > { %v963_v3 = vadd.f32 %v1538_v6, %v730_v1  ;;  %v979_v4 = vadd.f32 %v1538_v6, %v794_v2  ;;  %v1231_v5 = vpop.f32.mrb[2].mxu0  ;;  %v1247_v7 = vpop.f32.mrb[2].mxu1 }
  0xfe   : > { %997 = vst [vmem:[%s1545_s6 + $0x10] sm:$0xff] %v965_v63  ;;  %1013 = vst [vmem:[%s1545_s6 + $0x90] sm:$0xff] %v981_v0  ;;  %v966_v8 = vadd.f32 %v1231_v5, %v1538_v6  ;;  %v982_v10 = vadd.f32 %v1247_v7, %v1538_v6  ;;  %v733_v11 = vpop.f32.mrb[3].mxu0  ;;  %v797_v12 = vpop.f32.mrb[3].mxu1 }
  0xff   : > { %995 = vst [vmem:[%s1545_s6] sm:$0xff] %v963_v3  ;;  %1011 = vst [vmem:[%s1545_s6 + $0x80] sm:$0xff] %v979_v4  ;;  %v964_v13 = vadd.f32 %v1538_v6, %v733_v11  ;;  %v980_v14 = vadd.f32 %v1538_v6, %v797_v12 }
 0x100   : > { %998 = vst [vmem:[%s1545_s6 + $0x18] sm:$0xff] %v966_v8  ;;  %1014 = vst [vmem:[%s1545_s6 + $0x98] sm:$0xff] %v982_v10 }
 0x101   : > { %996 = vst [vmem:[%s1545_s6 + $0x8] sm:$0xff] %v964_v13  ;;  %1012 = vst [vmem:[%s1545_s6 + $0x88] sm:$0xff] %v980_v14 }
 0x103   : > { %v1234_v15 = vpop.f32.mrb[4].mxu0  ;;  %v1250_v16 = vpop.f32.mrb[4].mxu1 }
 0x104   : > { %v969_v17 = vadd.f32 %v1234_v15, %v1538_v6  ;;  %v985_v18 = vadd.f32 %v1250_v16, %v1538_v6  ;;  %v746_v19 = vpop.f32.mrb[5].mxu0  ;;  %v810_v20 = vpop.f32.mrb[5].mxu1 }
 0x105   : > { %v967_v21 = vadd.f32 %v1538_v6, %v746_v19  ;;  %v983_v22 = vadd.f32 %v1538_v6, %v810_v20  ;;  %v1235_v23 = vpop.f32.mrb[6].mxu0  ;;  %v1251_v24 = vpop.f32.mrb[6].mxu1 }
 0x106   : > { %1001 = vst [vmem:[%s1545_s6 + $0x30] sm:$0xff] %v969_v17  ;;  %1017 = vst [vmem:[%s1545_s6 + $0xb0] sm:$0xff] %v985_v18  ;;  %v970_v25 = vadd.f32 %v1235_v23, %v1538_v6  ;;  %v986_v26 = vadd.f32 %v1251_v24, %v1538_v6  ;;  %v749_v27 = vpop.f32.mrb[7].mxu0  ;;  %v813_v28 = vpop.f32.mrb[7].mxu1 }
 0x107   : > { %999 = vst [vmem:[%s1545_s6 + $0x20] sm:$0xff] %v967_v21  ;;  %1015 = vst [vmem:[%s1545_s6 + $0xa0] sm:$0xff] %v983_v22  ;;  %v968_v29 = vadd.f32 %v1538_v6, %v749_v27  ;;  %v984_v30 = vadd.f32 %v1538_v6, %v813_v28 }
 0x108   : > { %1002 = vst [vmem:[%s1545_s6 + $0x38] sm:$0xff] %v970_v25  ;;  %1018 = vst [vmem:[%s1545_s6 + $0xb8] sm:$0xff] %v986_v26 }
 0x109   : > { %1000 = vst [vmem:[%s1545_s6 + $0x28] sm:$0xff] %v968_v29  ;;  %1016 = vst [vmem:[%s1545_s6 + $0xa8] sm:$0xff] %v984_v30 }
 0x10b   : > { %v1238_v31 = vpop.f32.mrb[8].mxu0  ;;  %v1254_v32 = vpop.f32.mrb[8].mxu1 }
 0x10c   : > { %v973_v33 = vadd.f32 %v1238_v31, %v1538_v6  ;;  %v989_v34 = vadd.f32 %v1254_v32, %v1538_v6  ;;  %v762_v35 = vpop.f32.mrb[9].mxu0  ;;  %v826_v36 = vpop.f32.mrb[9].mxu1 }
 0x10d   : > { %v971_v37 = vadd.f32 %v1538_v6, %v762_v35  ;;  %v987_v38 = vadd.f32 %v1538_v6, %v826_v36  ;;  %v1239_v39 = vpop.f32.mrb[10].mxu0  ;;  %v1255_v40 = vpop.f32.mrb[10].mxu1 }
 0x10e   : > { %1005 = vst [vmem:[%s1545_s6 + $0x50] sm:$0xff] %v973_v33  ;;  %1021 = vst [vmem:[%s1545_s6 + $0xd0] sm:$0xff] %v989_v34  ;;  %v974_v41 = vadd.f32 %v1239_v39, %v1538_v6  ;;  %v990_v42 = vadd.f32 %v1255_v40, %v1538_v6  ;;  %v765_v43 = vpop.f32.mrb[11].mxu0  ;;  %v829_v44 = vpop.f32.mrb[11].mxu1 }
 0x10f   : > { %1003 = vst [vmem:[%s1545_s6 + $0x40] sm:$0xff] %v971_v37  ;;  %1019 = vst [vmem:[%s1545_s6 + $0xc0] sm:$0xff] %v987_v38  ;;  %v972_v45 = vadd.f32 %v1538_v6, %v765_v43  ;;  %v988_v46 = vadd.f32 %v1538_v6, %v829_v44 }
 0x110   : > { %1006 = vst [vmem:[%s1545_s6 + $0x58] sm:$0xff] %v974_v41  ;;  %1022 = vst [vmem:[%s1545_s6 + $0xd8] sm:$0xff] %v990_v42 }
 0x111   : > { %1004 = vst [vmem:[%s1545_s6 + $0x48] sm:$0xff] %v972_v45  ;;  %1020 = vst [vmem:[%s1545_s6 + $0xc8] sm:$0xff] %v988_v46 }
 0x113   : > { %v1242_v47 = vpop.f32.mrb[12].mxu0 }
 0x114   : > { %v977_v49 = vadd.f32 %v1242_v47, %v1538_v6  ;;  %v778_v50 = vpop.f32.mrb[13].mxu0 }
 0x115   : > { %v975_v51 = vadd.f32 %v1538_v6, %v778_v50  ;;  %v1243_v52 = vpop.f32.mrb[14].mxu0 }
 0x116   : > { %1009 = vst [vmem:[%s1545_s6 + $0x70] sm:$0xff] %v977_v49  ;;  %v978_v48 = vadd.f32 %v1243_v52, %v1538_v6  ;;  %v781_v54 = vpop.f32.mrb[15].mxu0 }
 0x117   : > { %v1258_v53 = vpop.f32.mrb[12].mxu1  ;;  %1007 = vst [vmem:[%s1545_s6 + $0x60] sm:$0xff] %v975_v51  ;;  %v976_v57 = vadd.f32 %v1538_v6, %v781_v54 }
 0x118   : > { %v993_v55 = vadd.f32 %v1258_v53, %v1538_v6  ;;  %v842_v56 = vpop.f32.mrb[13].mxu1  ;;  %1010 = vst [vmem:[%s1545_s6 + $0x78] sm:$0xff] %v978_v48 }
 0x119   : > { %v991_v58 = vadd.f32 %v1538_v6, %v842_v56  ;;  %v1259_v59 = vpop.f32.mrb[14].mxu1  ;;  %1008 = vst [vmem:[%s1545_s6 + $0x68] sm:$0xff] %v976_v57 }
 0x11a   : > { %1025 = vst [vmem:[%s1545_s6 + $0xf0] sm:$0xff] %v993_v55  ;;  %v994_v60 = vadd.f32 %v1259_v59, %v1538_v6  ;;  %v845_v61 = vpop.f32.mrb[15].mxu1 }
 0x11b   : > { %1023 = vst [vmem:[%s1545_s6 + $0xe0] sm:$0xff] %v991_v58  ;;  %v992_v9 = vadd.f32 %v1538_v6, %v845_v61 }
 0x11c   : > { %1026 = vst [vmem:[%s1545_s6 + $0xf8] sm:$0xff] %v994_v60 }
 0x11d   : > { %1024 = vst [vmem:[%s1545_s6 + $0xe8] sm:$0xff] %v992_v9 }
 0x11e PF: > { %s15_s20 = sadd.s32 1, %s1330_s20   ;;  %s1626_s18 = smov %s1326_s19 }
 0x11f   : > { %p12_p5 = scmp.ge.s32.totalorder %s15_s20, 4   ;;  %s1627_s19 = smov %s1629_s21 }
 0x121   :  { %14 = sbr.rel (!%p12_p5) target bundleno = 2 (0x2), region = 90 }

// kernel: scale_prediction_forward.3
= control target key start
LH: loop header
LB: loop body
LE: loop exit
PB: predicated region body
PF: predicated region fallthrough
CT: control target
= control target key end

     0   :  { %s2602_s12 = smov 0   ;;  %s2604_s13 = smov 0   ;;  %s3017_s0 = inlined_call_operand.vmem [shape: bf16[512,640], index: 0, kind: input, shape index: {}]   ;;  %s3018_s1 = inlined_call_operand.vmem [shape: bf16[640,128], index: 1, kind: input, shape index: {}]   ;;  %s3019_s2 = inlined_call_operand.vmem [shape: f32[1,128], index: 2, kind: input, shape index: {}]   ;;  %s3020_s3 = inlined_call_operand.vmem [shape: f32[512,128], index: 3, kind: output, shape index: {}]  }
   0x1   :  { %s2606_s14 = smov 0  }
   0x2 LB: > { %s32_s15 = sadd.s32 1, %s2576_s13  ;;  %p1941_p0 = scmp.ge.s32.totalorder %s2580_s14, 1  ;;  %s2580_s14 = sphi %s2606_s14, %s13_s14   ;;  %s2576_s13 = sphi %s2604_s13, %s3022_s13   ;;  %s2572_s12 = sphi %s2602_s12, %s3021_s12  }
   0x3   : > { %p34_p1 = scmp.ge.s32.totalorder %s32_s15, 2  ;;  %p191_p2 = scmp.lt.s32.totalorder %s2580_s14, 3 }
   0x5   : > { %s3024_s15 = smov (%p34_p1, %s32_s15), 0  ;;  %p192_p3 = pnand %p1941_p0, %p191_p2 }
   0x6   : > { %v2406_v0 = vld [vmem:[%s3018_s1 + $0x40] sm:$0xff] (!%p192_p3)   ;;  %s1942_s18 = sshll.u32 (!%p192_p3), %s2572_s12, 5  ;;  %v2408_v2 = vld [vmem:[%s3018_s1 + $0x48] sm:$0xff] (!%p192_p3)   ;;  %v2410_v4 = vld [vmem:[%s3018_s1 + $0x50] sm:$0xff] (!%p192_p3)  }
   0x7   : > { %195 = sbr.rel (%p192_p3) target bundleno = 415 (0x19f), region = 32  ;;  %v2407_v1 = vld [vmem:[%s3018_s1] sm:$0xff] (!%p192_p3)   ;;  %2069 = vmatprep.subr.bf16.mxu0 (!%p192_p3), %v2406_v0  ;;  %2365 = vmatprep.subr.bf16.mxu1 (!%p192_p3), %v2406_v0  ;;  %p236_p4 = scmp.lt.s32.totalorder (!%p192_p3), %s1942_s18, 63  ;;  %v2409_v3 = vld [vmem:[%s3018_s1 + $0x8] sm:$0xff] (!%p192_p3)   ;;  %v2411_v5 = vld [vmem:[%s3018_s1 + $0x10] sm:$0xff] (!%p192_p3)  }
   0x8   : > { %2070 = vmatpush3.bf16.msra.mxu0 (!%p192_p3), %v2407_v1  ;;  %2373 = vmatpush3.bf16.msra.mxu1 (!%p192_p3), %v2407_v1  ;;  %v2412_v6 = vld [vmem:[%s3018_s1 + $0x58] sm:$0xff] (!%p192_p3)   ;;  %v2414_v8 = vld [vmem:[%s3018_s1 + $0x60] sm:$0xff] (!%p192_p3)   ;;  %v2416_v10 = vld [vmem:[%s3018_s1 + $0x68] sm:$0xff] (!%p192_p3)  }
   0x9   : > { %2071 = vmatprep.subr.bf16.mxu0 (!%p192_p3), %v2408_v2  ;;  %2366 = vmatprep.subr.bf16.mxu1 (!%p192_p3), %v2408_v2  ;;  %v2413_v7 = vld [vmem:[%s3018_s1 + $0x18] sm:$0xff] (!%p192_p3)   ;;  %v2415_v9 = vld [vmem:[%s3018_s1 + $0x20] sm:$0xff] (!%p192_p3)   ;;  %v2417_v13 = vld [vmem:[%s3018_s1 + $0x28] sm:$0xff] (!%p192_p3)  }
   0xa   : > { %v2418_v14 = vld [vmem:[%s3018_s1 + $0x70] sm:$0xff] (!%p192_p3)   ;;  %v2420_v16 = vld [vmem:[%s3018_s1 + $0x78] sm:$0xff] (!%p192_p3)   ;;  %v2428_v18 = vld [vmem:[%s3018_s1 + $0xc0] sm:$0xff] (!%p192_p3)  }
   0xb   : > { %v2419_v15 = vld [vmem:[%s3018_s1 + $0x30] sm:$0xff] (!%p192_p3)   ;;  %v2421_v17 = vld [vmem:[%s3018_s1 + $0x38] sm:$0xff] (!%p192_p3)   ;;  %v2431_v19 = vld [vmem:[%s3018_s1 + $0x100] sm:$0xff] (!%p192_p3)  }
   0xc   : > { %2072 = vmatpush3.bf16.msra.mxu0 (!%p192_p3), %v2409_v3  ;;  %2374 = vmatpush3.bf16.msra.mxu1 (!%p192_p3), %v2409_v3  ;;  %v2429_v22 = vld [vmem:[%s3018_s1 + $0x80] sm:$0xff] (!%p192_p3)   ;;  %v2430_v23 = vld [vmem:[%s3018_s1 + $0xc8] sm:$0xff] (!%p192_p3)   ;;  %v2439_v29 = vld [vmem:[%s3018_s1 + $0xd0] sm:$0xff] (!%p192_p3)  }
   0xd   : > { %2073 = vmatprep.subr.bf16.mxu0 (!%p192_p3), %v2410_v4  ;;  %2367 = vmatprep.subr.bf16.mxu1 (!%p192_p3), %v2410_v4  ;;  %v2450_v26 = vld [vmem:[%s3018_s1 + $0x108] sm:$0xff] (!%p192_p3)   ;;  %v2440_v31 = vld [vmem:[%s3018_s1 + $0x90] sm:$0xff] (!%p192_p3)   ;;  %v2441_v33 = vld [vmem:[%s3018_s1 + $0xd8] sm:$0xff] (!%p192_p3)  }
   0xe   : > { %s3026_s18 = smov (!%p236_p4, %s1942_s18), 63  ;;  %v2432_v27 = vld [vmem:[%s3018_s1 + $0x88] sm:$0xff]   ;;  %v2442_v35 = vld [vmem:[%s3018_s1 + $0x98] sm:$0xff]   ;;  %v2449_v36 = vld [vmem:[%s3018_s1 + $0xe0] sm:$0xff]  }
   0xf   : > { %s2381_s4 = smul.u32 20, %s3026_s18  ;;  %v2463_v38 = vld [vmem:[%s3018_s1 + $0x110] sm:$0xff]   ;;  %v2451_v40 = vld [vmem:[%s3018_s1 + $0xa0] sm:$0xff]   ;;  %v2452_v41 = vld [vmem:[%s3018_s1 + $0xe8] sm:$0xff]  }
  0x10   : > { %2074 = vmatpush3.bf16.msra.mxu0 %v2411_v5  ;;  %2375 = vmatpush3.bf16.msra.mxu1 %v2411_v5  ;;  %v2453_v44 = vld [vmem:[%s3018_s1 + $0xa8] sm:$0xff]   ;;  %v2477_v45 = vld [vmem:[%s3018_s1 + $0x118] sm:$0xff]   ;;  %v2460_v48 = vld [vmem:[%s3018_s1 + $0xf0] sm:$0xff]  }
  0x11   : > { %2075 = vmatprep.subr.bf16.mxu0 %v2412_v6  ;;  %2368 = vmatprep.subr.bf16.mxu1 %v2412_v6  ;;  %s2653_s11 = scalar_lea.vmem %s3017_s0, %s2381_s4  ;;  %v2461_v49 = vld [vmem:[%s3018_s1 + $0xb0] sm:$0xff]   ;;  %v2462_v50 = vld [vmem:[%s3018_s1 + $0xf8] sm:$0xff]   ;;  %v2484_v52 = vld [vmem:[%s3018_s1 + $0x120] sm:$0xff]  }
  0x12   : > { %v2424_v11 = vld [vmem:[%s2653_s11 + $0x4] ss:$20 sps:$4 sm:$0xff]   ;;  %v2422_v20 = vld [vmem:[%s2653_s11] ss:$20 sps:$4 sm:$0xff]   ;;  %v2437_v28 = vld [vmem:[%s2653_s11 + $0x28] ss:$20 sps:$4 sm:$0xff]  }
  0x13   : > { %v2427_v12 = vld [vmem:[%s2653_s11 + $0x1e4] ss:$20 sps:$4 sm:$0xff]   ;;  %1200 = vmatprep.mubr.bf16.mxu0 %v2424_v11  ;;  %v2425_v21 = vld [vmem:[%s2653_s11 + $0x1e0] ss:$20 sps:$4 sm:$0xff]   ;;  %v2438_v30 = vld [vmem:[%s2653_s11 + $0x208] ss:$20 sps:$4 sm:$0xff]  }
  0x14   : > { %2076 = vmatpush3.bf16.msra.mxu0 %v2413_v7  ;;  %2376 = vmatpush3.bf16.msra.mxu1 %v2413_v7  ;;  %v2433_v24 = vld [vmem:[%s2653_s11 + $0x2c] ss:$20 sps:$4 sm:$0xff]   ;;  %v2443_v32 = vld [vmem:[%s2653_s11 + $0x54] ss:$20 sps:$4 sm:$0xff]   ;;  %v2447_v37 = vld [vmem:[%s2653_s11 + $0x50] ss:$20 sps:$4 sm:$0xff]  }
  0x15   : > { %2077 = vmatprep.subr.bf16.mxu0 %v2414_v8  ;;  %2369 = vmatprep.subr.bf16.mxu1 %v2414_v8  ;;  %v2435_v25 = vld [vmem:[%s2653_s11 + $0x20c] ss:$20 sps:$4 sm:$0xff]   ;;  %v2445_v34 = vld [vmem:[%s2653_s11 + $0x234] ss:$20 sps:$4 sm:$0xff]   ;;  %v2448_v39 = vld [vmem:[%s2653_s11 + $0x230] ss:$20 sps:$4 sm:$0xff]  }
  0x16   : > { %1296 = vmatprep.mubr.bf16.mxu1 %v2427_v12  ;;  %v2454_v42 = vld [vmem:[%s2653_s11 + $0x7c] ss:$20 sps:$4 sm:$0xff]   ;;  %v2458_v46 = vld [vmem:[%s2653_s11 + $0x78] ss:$20 sps:$4 sm:$0xff]   ;;  %v2470_v56 = vld [vmem:[%s2653_s11 + $0xa0] ss:$20 sps:$4 sm:$0xff]  }
  0x17   : > { %v2456_v43 = vld [vmem:[%s2653_s11 + $0x25c] ss:$20 sps:$4 sm:$0xff]   ;;  %v2459_v47 = vld [vmem:[%s2653_s11 + $0x258] ss:$20 sps:$4 sm:$0xff]   ;;  %v2473_v59 = vld [vmem:[%s2653_s11 + $0x34] ss:$20 sps:$4 sm:$0xff]  }
  0x18   : > { %2078 = vmatpush3.bf16.msra.mxu0 %v2415_v9  ;;  %2377 = vmatpush3.bf16.msra.mxu1 %v2415_v9  ;;  %v2465_v51 = vld [vmem:[%s2653_s11 + $0xa4] ss:$20 sps:$4 sm:$0xff]   ;;  %v2469_v53 = vld [vmem:[%s2653_s11 + $0xc] ss:$20 sps:$4 sm:$0xff]   ;;  %v2467_v55 = vld [vmem:[%s2653_s11 + $0x8] ss:$20 sps:$4 sm:$0xff]  }
  0x19   : > { %2079 = vmatprep.subr.bf16.mxu0 %v2416_v10  ;;  %2370 = vmatprep.subr.bf16.mxu1 %v2416_v10  ;;  %v2464_v54 = vld [vmem:[%s3018_s1 + $0xb8] sm:$0xff]   ;;  %v2497_v57 = vld [vmem:[%s3018_s1 + $0x128] sm:$0xff]   ;;  %v2504_v60 = vld [vmem:[%s3018_s1 + $0x130] sm:$0xff]  }
  0x1a   : > { %v2471_v58 = vld [vmem:[%s2653_s11 + $0xcc] ss:$20 sps:$4 sm:$0xff]   ;;  %v2475_v61 = vld [vmem:[%s2653_s11 + $0xc8] ss:$20 sps:$4 sm:$0xff]   ;;  %v2476_v62 = vld [vmem:[%s2653_s11 + $0x30] ss:$20 sps:$4 sm:$0xff]  }
  0x1b   : > { %v2478_v63 = vld [vmem:[%s2653_s11 + $0xf4] ss:$20 sps:$4 sm:$0xff]   ;;  %v2480_v0 = vld [vmem:[%s2653_s11 + $0x5c] ss:$20 sps:$4 sm:$0xff]   ;;  %v2483_v3 = vld [vmem:[%s2653_s11 + $0x58] ss:$20 sps:$4 sm:$0xff]  }
  0x1c   : > { %2080 = vmatpush3.bf16.msra.mxu0 %v2417_v13  ;;  %2378 = vmatpush3.bf16.msra.mxu1 %v2417_v13  ;;  %v2517_v1 = vld [vmem:[%s3018_s1 + $0x138] sm:$0xff]   ;;  %v2482_v2 = vld [vmem:[%s2653_s11 + $0xf0] ss:$20 sps:$4 sm:$0xff]   ;;  %v2490_v7 = vld [vmem:[%s2653_s11 + $0x80] ss:$20 sps:$4 sm:$0xff]  }
  0x1d   : > { %2081 = vmatprep.subr.bf16.mxu0 %v2418_v14  ;;  %2371 = vmatprep.subr.bf16.mxu1 %v2418_v14  ;;  %v2485_v4 = vld [vmem:[%s2653_s11 + $0x11c] ss:$20 sps:$4 sm:$0xff]   ;;  %v2487_v5 = vld [vmem:[%s2653_s11 + $0x84] ss:$20 sps:$4 sm:$0xff]   ;;  %v2493_v9 = vld [vmem:[%s2653_s11 + $0xac] ss:$20 sps:$4 sm:$0xff]  }
  0x1e   : > { %v2489_v6 = vld [vmem:[%s2653_s11 + $0x118] ss:$20 sps:$4 sm:$0xff]   ;;  %v2495_v10 = vld [vmem:[%s2653_s11 + $0x140] ss:$20 sps:$4 sm:$0xff]   ;;  %v2496_v11 = vld [vmem:[%s2653_s11 + $0xa8] ss:$20 sps:$4 sm:$0xff]  }
  0x1f   : > { %v2491_v8 = vld [vmem:[%s2653_s11 + $0x144] ss:$20 sps:$4 sm:$0xff]   ;;  %v2498_v12 = vld [vmem:[%s2653_s11 + $0x16c] ss:$20 sps:$4 sm:$0xff]   ;;  %v2500_v13 = vld [vmem:[%s2653_s11 + $0xd4] ss:$20 sps:$4 sm:$0xff]  }
  0x20   : > { %2082 = vmatpush3.bf16.msra.mxu0 %v2419_v15  ;;  %2379 = vmatpush3.bf16.msra.mxu1 %v2419_v15  ;;  %v2502_v14 = vld [vmem:[%s2653_s11 + $0x168] ss:$20 sps:$4 sm:$0xff]   ;;  %v2503_v15 = vld [vmem:[%s2653_s11 + $0xd0] ss:$20 sps:$4 sm:$0xff]  }
  0x21   : > { %2083 = vmatprep.subr.bf16.mxu0 %v2420_v16  ;;  %2372 = vmatprep.subr.bf16.mxu1 %v2420_v16  ;;  %v2505_v16 = vld [vmem:[%s2653_s11 + $0x194] ss:$20 sps:$4 sm:$0xff]  }
  0x24   : > { %2084 = vmatpush3.bf16.msra.mxu0 %v2421_v17  ;;  %2380 = vmatpush3.bf16.msra.mxu1 %v2421_v17  ;;  %v2507_v17 = vld [vmem:[%s2653_s11 + $0xfc] ss:$20 sps:$4 sm:$0xff]  }
  0x25   : > { %2181 = vmatprep.subr.bf16.mxu1 %v2428_v18  ;;  %2317 = vmatprep.subr.bf16.mxu0 %v2431_v19  ;;  %v2509_v18 = vld [vmem:[%s2653_s11 + $0x190] ss:$20 sps:$4 sm:$0xff]  }
  0x27   : > { %1201 = vmatmul.mubr.bf16.vlgmr.msra.gmra.mrb[0].mxu0 %v2422_v20  ;;  %1297 = vmatmul.mubr.bf16.vlgmr.msra.gmra.mrb[0].mxu1 %v2425_v21  ;;  %v2511_v20 = vld [vmem:[%s2653_s11 + $0x1bc] ss:$20 sps:$4 sm:$0xff]   ;;  %v2513_v21 = vld [vmem:[%s2653_s11 + $0x124] ss:$20 sps:$4 sm:$0xff]  }
  0x28   : > { %2182 = vmatpush3.bf16.msra.mxu1 %v2429_v22  ;;  %2318 = vmatpush3.bf16.msra.mxu0 %v2431_v19  ;;  %v2510_v19 = vld [vmem:[%s2653_s11 + $0xf8] ss:$20 sps:$4 sm:$0xff]  }
  0x29   : > { %2183 = vmatprep.subr.bf16.mxu1 %v2430_v23  ;;  %1208 = vmatprep.mubr.bf16.mxu0 %v2433_v24  ;;  %v2515_v22 = vld [vmem:[%s2653_s11 + $0x1b8] ss:$20 sps:$4 sm:$0xff]   ;;  %v2516_v23 = vld [vmem:[%s2653_s11 + $0x120] ss:$20 sps:$4 sm:$0xff]  }
  0x2a   : > { %1304 = vmatprep.mubr.bf16.mxu1 %v2435_v25  ;;  %2319 = vmatprep.subr.bf16.mxu0 %v2450_v26  ;;  %v2518_v24 = vld [vmem:[%s2653_s11 + $0x14c] ss:$20 sps:$4 sm:$0xff]   ;;  %v2520_v25 = vld [vmem:[%s2653_s11 + $0x10] ss:$20 sps:$4 sm:$0xff]  }
  0x2c   : > { %2184 = vmatpush3.bf16.msra.mxu1 %v2432_v27  ;;  %2320 = vmatpush3.bf16.msra.mxu0 %v2450_v26  ;;  %v2521_v26 = vld [vmem:[%s2653_s11 + $0x148] ss:$20 sps:$4 sm:$0xff]   ;;  %v2522_v27 = vld [vmem:[%s2653_s11 + $0x38] ss:$20 sps:$4 sm:$0xff]  }
  0x2d   : > { %2185 = vmatprep.subr.bf16.mxu1 %v2439_v29  ;;  %2321 = vmatprep.subr.bf16.mxu0 %v2463_v38  ;;  %v2525_v29 = vld [vmem:[%s2653_s11 + $0x60] ss:$20 sps:$4 sm:$0xff]  }
  0x2f   : > { %1209 = vmatmul.mubr.bf16.gmra.mrb[4].mxu0 %v2437_v28  ;;  %1305 = vmatmul.mubr.bf16.gmra.mrb[4].mxu1 %v2438_v30  ;;  %v2523_v28 = vld [vmem:[%s2653_s11 + $0x174] ss:$20 sps:$4 sm:$0xff]   ;;  %v2526_v30 = vld [vmem:[%s2653_s11 + $0x170] ss:$20 sps:$4 sm:$0xff]  }
  0x30   : > { %2186 = vmatpush3.bf16.msra.mxu1 %v2440_v31  ;;  %1216 = vmatprep.mubr.bf16.mxu0 %v2443_v32  ;;  %v2527_v31 = vld [vmem:[%s2653_s11 + $0x88] ss:$20 sps:$4 sm:$0xff]  }
  0x31   : > { %2187 = vmatprep.subr.bf16.mxu1 %v2441_v33  ;;  %1312 = vmatprep.mubr.bf16.mxu1 %v2445_v34  ;;  %v2528_v32 = vld [vmem:[%s2653_s11 + $0x19c] ss:$20 sps:$4 sm:$0xff]   ;;  %v2531_v34 = vld [vmem:[%s2653_s11 + $0x198] ss:$20 sps:$4 sm:$0xff]  }
  0x32   : > { %2322 = vmatpush3.bf16.msra.mxu0 %v2463_v38  ;;  %v2530_v33 = vld [vmem:[%s2653_s11 + $0xb0] ss:$20 sps:$4 sm:$0xff]   ;;  %v2536_v38 = vld [vmem:[%s2653_s11 + $0x1c0] ss:$20 sps:$4 sm:$0xff]  }
  0x33   : > { %2323 = vmatprep.subr.bf16.mxu0 %v2477_v45 }
  0x34   : > { %2188 = vmatpush3.bf16.msra.mxu1 %v2442_v35  ;;  %v2532_v35 = vld [vmem:[%s2653_s11 + $0xd8] ss:$20 sps:$4 sm:$0xff]  }
  0x35   : > { %2189 = vmatprep.subr.bf16.mxu1 %v2449_v36  ;;  %v2533_v36 = vld [vmem:[%s2653_s11 + $0x1c4] ss:$20 sps:$4 sm:$0xff]  }
  0x36   : > { %2324 = vmatpush3.bf16.msra.mxu0 %v2477_v45  ;;  %v2545_v45 = vld [vmem:[%s2653_s11 + $0x1a0] ss:$20 sps:$4 sm:$0xff]  }
  0x37   : > { %1217 = vmatmul.mubr.bf16.gmra.mrb[8].mxu0 %v2447_v37  ;;  %1313 = vmatmul.mubr.bf16.gmra.mrb[8].mxu1 %v2448_v39  ;;  %v2535_v37 = vld [vmem:[%s2653_s11 + $0x100] ss:$20 sps:$4 sm:$0xff]   ;;  %v2537_v39 = vld [vmem:[%s2653_s11 + $0x128] ss:$20 sps:$4 sm:$0xff]  }
  0x38   : > { %2190 = vmatpush3.bf16.msra.mxu1 %v2451_v40  ;;  %1224 = vmatprep.mubr.bf16.mxu0 %v2454_v42  ;;  %v2538_v40 = vld [vmem:[%s2653_s11 + $0x1ec] ss:$20 sps:$4 sm:$0xff]   ;;  %v2541_v42 = vld [vmem:[%s2653_s11 + $0x1e8] ss:$20 sps:$4 sm:$0xff]  }
  0x39   : > { %2191 = vmatprep.subr.bf16.mxu1 %v2452_v41  ;;  %1320 = vmatprep.mubr.bf16.mxu1 %v2456_v43  ;;  %v2540_v41 = vld [vmem:[%s2653_s11 + $0x150] ss:$20 sps:$4 sm:$0xff]   ;;  %v2542_v43 = vld [vmem:[%s2653_s11 + $0x178] ss:$20 sps:$4 sm:$0xff]  }
  0x3a   : > { %2325 = vmatprep.subr.bf16.mxu0 %v2484_v52 }
  0x3b   : > { %2326 = vmatpush3.bf16.msra.mxu0 %v2484_v52  ;;  %v2553_v52 = vld [vmem:[%s2653_s11 + $0x264] ss:$20 sps:$4 sm:$0xff]  }
  0x3c   : > { %2192 = vmatpush3.bf16.msra.mxu1 %v2453_v44  ;;  %2327 = vmatprep.subr.bf16.mxu0 %v2497_v57  ;;  %v2543_v44 = vld [vmem:[%s2653_s11 + $0x214] ss:$20 sps:$4 sm:$0xff]  }
  0x3d   : > { %2193 = vmatprep.subr.bf16.mxu1 %v2460_v48  ;;  %v2548_v48 = vld [vmem:[%s2653_s11 + $0x23c] ss:$20 sps:$4 sm:$0xff]  }
  0x3f   : > { %1225 = vmatmul.mubr.bf16.gmra.mrb[12].mxu0 %v2458_v46  ;;  %1321 = vmatmul.mubr.bf16.gmra.mrb[12].mxu1 %v2459_v47  ;;  %v2546_v46 = vld [vmem:[%s2653_s11 + $0x210] ss:$20 sps:$4 sm:$0xff]   ;;  %v2547_v47 = vld [vmem:[%s2653_s11 + $0x1c8] ss:$20 sps:$4 sm:$0xff]  }
  0x40   : > { %2194 = vmatpush3.bf16.msra.mxu1 %v2461_v49  ;;  %1232 = vmatprep.mubr.bf16.mxu0 %v2465_v51  ;;  %v2550_v49 = vld [vmem:[%s2653_s11 + $0x1f0] ss:$20 sps:$4 sm:$0xff]   ;;  %v2552_v51 = vld [vmem:[%s2653_s11 + $0x218] ss:$20 sps:$4 sm:$0xff]  }
  0x41   : > { %2195 = vmatprep.subr.bf16.mxu1 %v2462_v50  ;;  %1361 = vmatprep.mubr.bf16.mxu1 %v2469_v53  ;;  %v2551_v50 = vld [vmem:[%s2653_s11 + $0x238] ss:$20 sps:$4 sm:$0xff]   ;;  %v2555_v53 = vld [vmem:[%s2653_s11 + $0x240] ss:$20 sps:$4 sm:$0xff]  }
  0x42   : > { %2328 = vmatpush3.bf16.msra.mxu0 %v2497_v57 }
  0x43   : > { %2329 = vmatprep.subr.bf16.mxu0 %v2504_v60 }
  0x44   : > { %2196 = vmatpush3.bf16.msra.mxu1 %v2464_v54  ;;  %v2556_v54 = vld [vmem:[%s2653_s11 + $0x260] ss:$20 sps:$4 sm:$0xff]  }
  0x46   : > { %2330 = vmatpush3.bf16.msra.mxu0 %v2504_v60 }
  0x47   : > { %1233 = vmatmul.mubr.bf16.gmra.mrb[16].mxu0 %v2470_v56  ;;  %1362 = vmatmul.mubr.bf16.vlgmr.msra.gmra.mrb[16].mxu1 %v2467_v55  ;;  %v2557_v55 = vld [vmem:[%s2653_s11 + $0x268] ss:$20 sps:$4 sm:$0xff]   ;;  %s1945_s11 = sshll.u32 %s3026_s18, 3 }
  0x48   : > { %1240 = vmatprep.mubr.bf16.mxu0 %v2471_v58  ;;  %1369 = vmatprep.mubr.bf16.mxu1 %v2473_v59  ;;  %s2902_s12 = scalar_lea.vmem %s3020_s3, %s1945_s11 }
  0x49   : > { %2331 = vmatprep.subr.bf16.mxu0 %v2517_v1 }
  0x4a   : > { %2332 = vmatpush3.bf16.msra.mxu0 %v2517_v1 }
  0x4f   : > { %1241 = vmatmul.mubr.bf16.gmra.mrb[20].mxu0 %v2475_v61  ;;  %1370 = vmatmul.mubr.bf16.gmra.mrb[20].mxu1 %v2476_v62 }
  0x50   : > { %1248 = vmatprep.mubr.bf16.mxu0 %v2478_v63  ;;  %1377 = vmatprep.mubr.bf16.mxu1 %v2480_v0 }
  0x57   : > { %1249 = vmatmul.mubr.bf16.gmra.mrb[24].mxu0 %v2482_v2  ;;  %1378 = vmatmul.mubr.bf16.gmra.mrb[24].mxu1 %v2483_v3 }
  0x58   : > { %1256 = vmatprep.mubr.bf16.mxu0 %v2485_v4  ;;  %1385 = vmatprep.mubr.bf16.mxu1 %v2487_v5 }
  0x5f   : > { %1257 = vmatmul.mubr.bf16.gmra.mrb[28].mxu0 %v2489_v6  ;;  %1386 = vmatmul.mubr.bf16.gmra.mrb[28].mxu1 %v2490_v7 }
  0x60   : > { %1264 = vmatprep.mubr.bf16.mxu0 %v2491_v8  ;;  %1393 = vmatprep.mubr.bf16.mxu1 %v2493_v9 }
  0x67   : > { %1265 = vmatmul.mubr.bf16.gmra.mrb[32].mxu0 %v2495_v10  ;;  %1394 = vmatmul.mubr.bf16.gmra.mrb[32].mxu1 %v2496_v11 }
  0x68   : > { %1272 = vmatprep.mubr.bf16.mxu0 %v2498_v12  ;;  %1401 = vmatprep.mubr.bf16.mxu1 %v2500_v13 }
  0x6f   : > { %1273 = vmatmul.mubr.bf16.gmra.mrb[36].mxu0 %v2502_v14  ;;  %1402 = vmatmul.mubr.bf16.gmra.mrb[36].mxu1 %v2503_v15 }
  0x70   : > { %1280 = vmatprep.mubr.bf16.mxu0 %v2505_v16  ;;  %1409 = vmatprep.mubr.bf16.mxu1 %v2507_v17 }
  0x77   : > { %1281 = vmatmul.mubr.bf16.gmra.mrb[40].mxu0 %v2509_v18  ;;  %1410 = vmatmul.mubr.bf16.gmra.mrb[40].mxu1 %v2510_v19 }
  0x78   : > { %1288 = vmatprep.mubr.bf16.mxu0 %v2511_v20  ;;  %1417 = vmatprep.mubr.bf16.mxu1 %v2513_v21 }
  0x7f   : > { %1289 = vmatmul.mubr.bf16.gmra.mrb[44].mxu0 %v2515_v22  ;;  %1418 = vmatmul.mubr.bf16.gmra.mrb[44].mxu1 %v2516_v23 }
  0x80   : > { %1425 = vmatprep.mubr.bf16.mxu1 %v2518_v24  ;;  %2333 = vmatprep.mubr.bf16.mxu0 %v2520_v25 }
  0x87   : > { %1426 = vmatmul.mubr.bf16.gmra.mrb[48].mxu1 %v2521_v26  ;;  %2334 = vmatmul.mubr.bf16.vlgmr.msra.gmra.mrb[48].mxu0 %v2522_v27 }
  0x88   : > { %1433 = vmatprep.mubr.bf16.mxu1 %v2523_v28  ;;  %2337 = vmatprep.mubr.bf16.mxu0 %v2525_v29 }
  0x8f   : > { %1434 = vmatmul.mubr.bf16.gmra.mrb[52].mxu1 %v2526_v30  ;;  %2338 = vmatmul.mubr.bf16.gmra.mrb[52].mxu0 %v2527_v31 }
  0x90   : > { %1441 = vmatprep.mubr.bf16.mxu1 %v2528_v32  ;;  %2341 = vmatprep.mubr.bf16.mxu0 %v2530_v33 }
  0x97   : > { %1442 = vmatmul.mubr.bf16.gmra.mrb[56].mxu1 %v2531_v34  ;;  %2342 = vmatmul.mubr.bf16.gmra.mrb[56].mxu0 %v2532_v35 }
  0x98   : > { %1449 = vmatprep.mubr.bf16.mxu1 %v2533_v36  ;;  %2345 = vmatprep.mubr.bf16.mxu0 %v2535_v37 }
  0x9f   : > { %1450 = vmatmul.mubr.bf16.gmra.mrb[60].mxu1 %v2536_v38  ;;  %2346 = vmatmul.mubr.bf16.gmra.mrb[60].mxu0 %v2537_v39 }
  0xa0   : > { %1457 = vmatprep.mubr.bf16.mxu1 %v2538_v40  ;;  %2349 = vmatprep.mubr.bf16.mxu0 %v2540_v41 }
  0xa7   : > { %1458 = vmatmul.mubr.bf16.gmra.mrb[64].mxu1 %v2541_v42  ;;  %2350 = vmatmul.mubr.bf16.gmra.mrb[64].mxu0 %v2542_v43 }
  0xa8   : > { %1465 = vmatprep.mubr.bf16.mxu1 %v2543_v44  ;;  %2353 = vmatprep.mubr.bf16.mxu0 %v2545_v45 }
  0xaf   : > { %1466 = vmatmul.mubr.bf16.gmra.mrb[68].mxu1 %v2546_v46  ;;  %2354 = vmatmul.mubr.bf16.gmra.mrb[68].mxu0 %v2547_v47 }
  0xb0   : > { %1473 = vmatprep.mubr.bf16.mxu1 %v2548_v48  ;;  %2357 = vmatprep.mubr.bf16.mxu0 %v2550_v49 }
  0xb7   : > { %1474 = vmatmul.mubr.bf16.gmra.mrb[72].mxu1 %v2551_v50  ;;  %2358 = vmatmul.mubr.bf16.gmra.mrb[72].mxu0 %v2552_v51 }
  0xb8   : > { %1481 = vmatprep.mubr.bf16.mxu1 %v2553_v52  ;;  %2361 = vmatprep.mubr.bf16.mxu0 %v2555_v53 }
  0xbf   : > { %1482 = vmatmul.mubr.bf16.gmra.mrb[76].mxu1 %v2556_v54  ;;  %2362 = vmatmul.mubr.bf16.gmra.mrb[76].mxu0 %v2557_v55 }
  0xfa   : > { %v2157_v56 = vpop.f32.mrb[0].mxu1  ;;  %v2085_v57 = vpop.f32.mrb[0].mxu0 }
  0xfb   : > { %v2158_v58 = vpop.f32.mrb[1].mxu1  ;;  %v2086_v59 = vpop.f32.mrb[1].mxu0 }
  0xfc   : > { %v2828_v60 = vadd.f32 %v2158_v58, %v2157_v56  ;;  %v2160_v61 = vpop.f32.mrb[2].mxu1  ;;  %v2087_v62 = vadd.f32 %v2086_v59, %v2085_v57  ;;  %v2088_v63 = vpop.f32.mrb[2].mxu0 }
  0xfd   : > { %v2161_v0 = vpop.f32.mrb[3].mxu1  ;;  %v2089_v1 = vpop.f32.mrb[3].mxu0 }
  0xfe   : > { %v2830_v2 = vadd.f32 %v2161_v0, %v2160_v61  ;;  %v2090_v3 = vadd.f32 %v2089_v1, %v2088_v63 }
 0x102   : > { %v2163_v4 = vpop.f32.mrb[4].mxu1  ;;  %v2091_v5 = vpop.f32.mrb[4].mxu0 }
 0x103   : > { %v2164_v6 = vpop.f32.mrb[5].mxu1  ;;  %v2092_v7 = vpop.f32.mrb[5].mxu0 }
 0x104   : > { %v2832_v8 = vadd.f32 %v2164_v6, %v2163_v4  ;;  %v2166_v9 = vpop.f32.mrb[6].mxu1  ;;  %v2093_v10 = vadd.f32 %v2092_v7, %v2091_v5  ;;  %v2094_v11 = vpop.f32.mrb[6].mxu0 }
 0x105   : > { %v2167_v12 = vpop.f32.mrb[7].mxu1  ;;  %v2095_v13 = vpop.f32.mrb[7].mxu0 }
 0x106   : > { %v2834_v14 = vadd.f32 %v2167_v12, %v2166_v9  ;;  %v2096_v15 = vadd.f32 %v2095_v13, %v2094_v11 }
 0x10a   : > { %v2169_v16 = vpop.f32.mrb[8].mxu1  ;;  %v2097_v17 = vpop.f32.mrb[8].mxu0 }
 0x10b   : > { %v2170_v18 = vpop.f32.mrb[9].mxu1  ;;  %v2098_v19 = vpop.f32.mrb[9].mxu0 }
 0x10c   : > { %v2836_v20 = vadd.f32 %v2170_v18, %v2169_v16  ;;  %v2172_v21 = vpop.f32.mrb[10].mxu1  ;;  %v2099_v22 = vadd.f32 %v2098_v19, %v2097_v17  ;;  %v2100_v23 = vpop.f32.mrb[10].mxu0 }
 0x10d   : > { %v2173_v24 = vpop.f32.mrb[11].mxu1  ;;  %v2101_v25 = vpop.f32.mrb[11].mxu0 }
 0x10e   : > { %v2838_v26 = vadd.f32 %v2173_v24, %v2172_v21  ;;  %v2102_v27 = vadd.f32 %v2101_v25, %v2100_v23 }
 0x112   : > { %v2175_v28 = vpop.f32.mrb[12].mxu1  ;;  %v2103_v29 = vpop.f32.mrb[12].mxu0 }
 0x113   : > { %v2176_v30 = vpop.f32.mrb[13].mxu1  ;;  %v2104_v31 = vpop.f32.mrb[13].mxu0 }
 0x114   : > { %v2840_v32 = vadd.f32 %v2176_v30, %v2175_v28  ;;  %v2178_v33 = vpop.f32.mrb[14].mxu1  ;;  %v2105_v34 = vadd.f32 %v2104_v31, %v2103_v29  ;;  %v2106_v35 = vpop.f32.mrb[14].mxu0 }
 0x115   : > { %v2179_v36 = vpop.f32.mrb[15].mxu1  ;;  %v2107_v37 = vpop.f32.mrb[15].mxu0 }
 0x116   : > { %v2842_v38 = vadd.f32 %v2179_v36, %v2178_v33  ;;  %v2108_v39 = vadd.f32 %v2107_v37, %v2106_v35 }
 0x11a   : > { %v2197_v40 = vpop.f32.mrb[16].mxu1  ;;  %v2109_v41 = vpop.f32.mrb[16].mxu0 }
 0x11b   : > { %v2198_v42 = vpop.f32.mrb[17].mxu1  ;;  %v2110_v43 = vpop.f32.mrb[17].mxu0 }
 0x11c   : > { %v2199_v44 = vadd.f32 %v2198_v42, %v2197_v40  ;;  %v2200_v45 = vpop.f32.mrb[18].mxu1  ;;  %v2111_v46 = vadd.f32 %v2110_v43, %v2109_v41  ;;  %v2112_v47 = vpop.f32.mrb[18].mxu0 }
 0x11d   : > { %v2201_v48 = vpop.f32.mrb[19].mxu1  ;;  %v2113_v49 = vpop.f32.mrb[19].mxu0 }
 0x11e   : > { %v2202_v50 = vadd.f32 %v2201_v48, %v2200_v45  ;;  %v2114_v51 = vadd.f32 %v2113_v49, %v2112_v47  ;;  %v2844_v52 = vadd.f32 %v2199_v44, %v2087_v62 }
 0x120   : > { %v2846_v53 = vadd.f32 %v2202_v50, %v2090_v3 }
 0x122   : > { %v2203_v54 = vpop.f32.mrb[20].mxu1  ;;  %v2115_v55 = vpop.f32.mrb[20].mxu0 }
 0x123   : > { %v2204_v56 = vpop.f32.mrb[21].mxu1  ;;  %v2116_v57 = vpop.f32.mrb[21].mxu0 }
 0x124   : > { %v2205_v58 = vadd.f32 %v2204_v56, %v2203_v54  ;;  %v2206_v59 = vpop.f32.mrb[22].mxu1  ;;  %v2117_v61 = vadd.f32 %v2116_v57, %v2115_v55  ;;  %v2118_v63 = vpop.f32.mrb[22].mxu0 }
 0x125   : > { %v2207_v0 = vpop.f32.mrb[23].mxu1  ;;  %v2119_v1 = vpop.f32.mrb[23].mxu0 }
 0x126   : > { %v2208_v4 = vadd.f32 %v2207_v0, %v2206_v59  ;;  %v2120_v5 = vadd.f32 %v2119_v1, %v2118_v63  ;;  %v2848_v6 = vadd.f32 %v2205_v58, %v2093_v10 }
 0x128   : > { %v2850_v7 = vadd.f32 %v2208_v4, %v2096_v15 }
 0x12a   : > { %v2209_v62 = vpop.f32.mrb[24].mxu1  ;;  %v2121_v9 = vpop.f32.mrb[24].mxu0 }
 0x12b   : > { %v2210_v3 = vpop.f32.mrb[25].mxu1  ;;  %v2122_v11 = vpop.f32.mrb[25].mxu0 }
 0x12c   : > { %v2211_v12 = vadd.f32 %v2210_v3, %v2209_v62  ;;  %v2212_v13 = vpop.f32.mrb[26].mxu1  ;;  %v2123_v16 = vadd.f32 %v2122_v11, %v2121_v9  ;;  %v2124_v17 = vpop.f32.mrb[26].mxu0 }
 0x12d   : > { %v2213_v18 = vpop.f32.mrb[27].mxu1  ;;  %v2125_v19 = vpop.f32.mrb[27].mxu0 }
 0x12e   : > { %v2214_v21 = vadd.f32 %v2213_v18, %v2212_v13  ;;  %v2126_v23 = vadd.f32 %v2125_v19, %v2124_v17  ;;  %v2852_v24 = vadd.f32 %v2211_v12, %v2099_v22 }
 0x130   : > { %v2854_v25 = vadd.f32 %v2214_v21, %v2102_v27 }
 0x132   : > { %v2215_v10 = vpop.f32.mrb[28].mxu1  ;;  %v2127_v28 = vpop.f32.mrb[28].mxu0 }
 0x133   : > { %v2216_v15 = vpop.f32.mrb[29].mxu1  ;;  %v2128_v29 = vpop.f32.mrb[29].mxu0 }
 0x134   : > { %v2217_v30 = vadd.f32 %v2216_v15, %v2215_v10  ;;  %v2218_v31 = vpop.f32.mrb[30].mxu1  ;;  %v2129_v33 = vadd.f32 %v2128_v29, %v2127_v28  ;;  %v2130_v35 = vpop.f32.mrb[30].mxu0 }
 0x135   : > { %v2219_v36 = vpop.f32.mrb[31].mxu1  ;;  %v2131_v37 = vpop.f32.mrb[31].mxu0 }
 0x136   : > { %v2220_v40 = vadd.f32 %v2219_v36, %v2218_v31  ;;  %v2132_v41 = vadd.f32 %v2131_v37, %v2130_v35  ;;  %v2856_v42 = vadd.f32 %v2217_v30, %v2105_v34 }
 0x138   : > { %v2858_v43 = vadd.f32 %v2220_v40, %v2108_v39 }
 0x13a   : > { %v2221_v22 = vpop.f32.mrb[32].mxu1  ;;  %v2133_v44 = vpop.f32.mrb[32].mxu0 }
 0x13b   : > { %v2222_v27 = vpop.f32.mrb[33].mxu1  ;;  %v2134_v45 = vpop.f32.mrb[33].mxu0 }
 0x13c   : > { %v2223_v47 = vadd.f32 %v2222_v27, %v2221_v22  ;;  %v2224_v48 = vpop.f32.mrb[34].mxu1  ;;  %v2860_v49 = vadd.f32 %v2134_v45, %v2133_v44  ;;  %v2136_v50 = vpop.f32.mrb[34].mxu0 }
 0x13d   : > { %v2225_v54 = vpop.f32.mrb[35].mxu1  ;;  %v2137_v55 = vpop.f32.mrb[35].mxu0 }
 0x13e   : > { %v2226_v56 = vadd.f32 %v2225_v54, %v2224_v48  ;;  %v2862_v57 = vadd.f32 %v2137_v55, %v2136_v50  ;;  %v2864_v58 = vadd.f32 %v2223_v47, %v2111_v46 }
 0x140   : > { %v2866_v34 = vadd.f32 %v2226_v56, %v2114_v51 }
 0x142   : > { %v2227_v39 = vpop.f32.mrb[36].mxu1  ;;  %v2139_v59 = vpop.f32.mrb[36].mxu0 }
 0x143   : > { %v2228_v63 = vpop.f32.mrb[37].mxu1  ;;  %v2140_v0 = vpop.f32.mrb[37].mxu0 }
 0x144   : > { %v2229_v1 = vadd.f32 %v2228_v63, %v2227_v39  ;;  %v2230_v4 = vpop.f32.mrb[38].mxu1  ;;  %v2868_v62 = vadd.f32 %v2140_v0, %v2139_v59  ;;  %v2142_v9 = vpop.f32.mrb[38].mxu0  ;;  %v2896_v63 = vld [vmem:[%s3019_s2] ss:$0 sm:$0xff] }
 0x145   : > { %v2231_v3 = vpop.f32.mrb[39].mxu1  ;;  %v2143_v11 = vpop.f32.mrb[39].mxu0 }
 0x146   : > { %v2232_v12 = vadd.f32 %v2231_v3, %v2230_v4  ;;  %v2870_v13 = vadd.f32 %v2143_v11, %v2142_v9  ;;  %v2872_v17 = vadd.f32 %v2229_v1, %v2117_v61 }
 0x148   : > { %v2874_v46 = vadd.f32 %v2232_v12, %v2120_v5 }
 0x14a   : > { %v2233_v51 = vpop.f32.mrb[40].mxu1  ;;  %v2145_v18 = vpop.f32.mrb[40].mxu0 }
 0x14b   : > { %v2234_v19 = vpop.f32.mrb[41].mxu1  ;;  %v2146_v21 = vpop.f32.mrb[41].mxu0 }
 0x14c   : > { %v2235_v10 = vadd.f32 %v2234_v19, %v2233_v51  ;;  %v2236_v28 = vpop.f32.mrb[42].mxu1  ;;  %v2876_v15 = vadd.f32 %v2146_v21, %v2145_v18  ;;  %v2148_v29 = vpop.f32.mrb[42].mxu0 }
 0x14d   : > { %v2237_v30 = vpop.f32.mrb[43].mxu1  ;;  %v2149_v31 = vpop.f32.mrb[43].mxu0 }
 0x14e   : > { %v2238_v35 = vadd.f32 %v2237_v30, %v2236_v28  ;;  %v2878_v36 = vadd.f32 %v2149_v31, %v2148_v29  ;;  %v2880_v37 = vadd.f32 %v2235_v10, %v2123_v16 }
 0x150   : > { %v2882_v61 = vadd.f32 %v2238_v35, %v2126_v23 }
 0x152   : > { %v2239_v5 = vpop.f32.mrb[44].mxu1  ;;  %v2151_v40 = vpop.f32.mrb[44].mxu0 }
 0x153   : > { %v2240_v22 = vpop.f32.mrb[45].mxu1  ;;  %v2152_v44 = vpop.f32.mrb[45].mxu0 }
 0x154   : > { %v2241_v27 = vadd.f32 %v2240_v22, %v2239_v5  ;;  %v2242_v45 = vpop.f32.mrb[46].mxu1  ;;  %v2884_v47 = vadd.f32 %v2152_v44, %v2151_v40  ;;  %v2154_v48 = vpop.f32.mrb[46].mxu0 }
 0x155   : > { %v2243_v50 = vpop.f32.mrb[47].mxu1  ;;  %v2155_v54 = vpop.f32.mrb[47].mxu0 }
 0x156   : > { %v2244_v55 = vadd.f32 %v2243_v50, %v2242_v45  ;;  %v2886_v56 = vadd.f32 %v2155_v54, %v2154_v48  ;;  %v2888_v39 = vadd.f32 %v2241_v27, %v2129_v33 }
 0x158   : > { %v2890_v16 = vadd.f32 %v2244_v55, %v2132_v41 }
 0x15a   : > { %v2245_v23 = vpop.f32.mrb[48].mxu1  ;;  %v2335_v59 = vpop.f32.mrb[48].mxu0 }
 0x15b   : > { %v1533_v0 = vadd.f32 %v2335_v59, %v2848_v6  ;;  %v2246_v1 = vpop.f32.mrb[49].mxu1  ;;  %v1524_v4 = vpop.f32.mrb[49].mxu0 }
 0x15c   : > { %v2247_v33 = vadd.f32 %v2246_v1, %v2245_v23  ;;  %v1525_v41 = vadd.f32 %v1524_v4, %v2844_v52  ;;  %v2248_v9 = vpop.f32.mrb[50].mxu1  ;;  %v2336_v3 = vpop.f32.mrb[50].mxu0 }
 0x15d   : > { %v1759_v11 = vadd.f32 %v2896_v63, %v1533_v0  ;;  %v1536_v6 = vadd.f32 %v2336_v3, %v2850_v7  ;;  %v2249_v12 = vpop.f32.mrb[51].mxu1  ;;  %v1527_v51 = vpop.f32.mrb[51].mxu0 }
 0x15e   : > { %v1757_v18 = vadd.f32 %v2896_v63, %v1525_v41  ;;  %v2250_v19 = vadd.f32 %v2249_v12, %v2248_v9  ;;  %v1528_v21 = vadd.f32 %v1527_v51, %v2846_v53  ;;  %v2910_v10 = vadd.f32 %v2247_v33, %v2860_v49 }
 0x15f   : > { %1791 = vst [vmem:[%s2902_s12 + $0x10] sm:$0xff] %v1759_v11  ;;  %v1760_v52 = vadd.f32 %v2896_v63, %v1536_v6 }
 0x160   : > { %1789 = vst [vmem:[%s2902_s12] sm:$0xff] %v1757_v18  ;;  %v1758_v28 = vadd.f32 %v2896_v63, %v1528_v21  ;;  %v2917_v29 = vadd.f32 %v2250_v19, %v2862_v57 }
 0x161   : > { %1792 = vst [vmem:[%s2902_s12 + $0x18] sm:$0xff] %v1760_v52 }
 0x162   : > { %1790 = vst [vmem:[%s2902_s12 + $0x8] sm:$0xff] %v1758_v28  ;;  %v2251_v7 = vpop.f32.mrb[52].mxu1  ;;  %v2339_v30 = vpop.f32.mrb[52].mxu0 }
 0x163   : > { %v1549_v31 = vadd.f32 %v2339_v30, %v2856_v42  ;;  %v2252_v53 = vpop.f32.mrb[53].mxu1  ;;  %v1540_v49 = vpop.f32.mrb[53].mxu0 }
 0x164   : > { %v2253_v35 = vadd.f32 %v2252_v53, %v2251_v7  ;;  %v1541_v5 = vadd.f32 %v1540_v49, %v2852_v24  ;;  %v2254_v40 = vpop.f32.mrb[54].mxu1  ;;  %v2340_v22 = vpop.f32.mrb[54].mxu0 }
 0x165   : > { %v1763_v57 = vadd.f32 %v2896_v63, %v1549_v31  ;;  %v1552_v44 = vadd.f32 %v2340_v22, %v2858_v43  ;;  %v2255_v27 = vpop.f32.mrb[55].mxu1  ;;  %v1543_v45 = vpop.f32.mrb[55].mxu0 }
 0x166   : > { %v1761_v48 = vadd.f32 %v2896_v63, %v1541_v5  ;;  %v2256_v50 = vadd.f32 %v2255_v27, %v2254_v40  ;;  %v1544_v42 = vadd.f32 %v1543_v45, %v2854_v25  ;;  %v1436_v54 = vadd.f32 %v2253_v35, %v2868_v62 }
 0x167   : > { %1795 = vst [vmem:[%s2902_s12 + $0x30] sm:$0xff] %v1763_v57  ;;  %v1764_v24 = vadd.f32 %v2896_v63, %v1552_v44 }
 0x168   : > { %1793 = vst [vmem:[%s2902_s12 + $0x20] sm:$0xff] %v1761_v48  ;;  %v1762_v55 = vadd.f32 %v2896_v63, %v1544_v42  ;;  %v1439_v23 = vadd.f32 %v2256_v50, %v2870_v13 }
 0x169   : > { %1796 = vst [vmem:[%s2902_s12 + $0x38] sm:$0xff] %v1764_v24 }
 0x16a   : > { %1794 = vst [vmem:[%s2902_s12 + $0x28] sm:$0xff] %v1762_v55  ;;  %v2257_v43 = vpop.f32.mrb[56].mxu1  ;;  %v2343_v59 = vpop.f32.mrb[56].mxu0 }
 0x16b   : > { %v1565_v0 = vadd.f32 %v2343_v59, %v2872_v17  ;;  %v2258_v1 = vpop.f32.mrb[57].mxu1  ;;  %v1556_v25 = vpop.f32.mrb[57].mxu0 }
 0x16c   : > { %v2259_v4 = vadd.f32 %v2258_v1, %v2257_v43  ;;  %v1557_v62 = vadd.f32 %v1556_v25, %v2864_v58  ;;  %v2260_v33 = vpop.f32.mrb[58].mxu1  ;;  %v2344_v41 = vpop.f32.mrb[58].mxu0 }
 0x16d   : > { %v1767_v9 = vadd.f32 %v2896_v63, %v1565_v0  ;;  %v1568_v13 = vadd.f32 %v2344_v41, %v2874_v46  ;;  %v2261_v3 = vpop.f32.mrb[59].mxu1  ;;  %v1559_v11 = vpop.f32.mrb[59].mxu0 }
 0x16e   : > { %v1765_v6 = vadd.f32 %v2896_v63, %v1557_v62  ;;  %v2262_v12 = vadd.f32 %v2261_v3, %v2260_v33  ;;  %v1560_v17 = vadd.f32 %v1559_v11, %v2866_v34  ;;  %v1444_v51 = vadd.f32 %v2259_v4, %v2876_v15 }
 0x16f   : > { %1799 = vst [vmem:[%s2902_s12 + $0x50] sm:$0xff] %v1767_v9  ;;  %v1768_v58 = vadd.f32 %v2896_v63, %v1568_v13 }
 0x170   : > { %1797 = vst [vmem:[%s2902_s12 + $0x40] sm:$0xff] %v1765_v6  ;;  %v1766_v18 = vadd.f32 %v2896_v63, %v1560_v17  ;;  %v2947_v19 = vadd.f32 %v2262_v12, %v2878_v36 }
 0x171   : > { %1800 = vst [vmem:[%s2902_s12 + $0x58] sm:$0xff] %v1768_v58 }
 0x172   : > { %1798 = vst [vmem:[%s2902_s12 + $0x48] sm:$0xff] %v1766_v18  ;;  %v2263_v46 = vpop.f32.mrb[60].mxu1  ;;  %v2347_v21 = vpop.f32.mrb[60].mxu0 }
 0x173   : > { %v1581_v52 = vadd.f32 %v2347_v21, %v2888_v39  ;;  %v2264_v28 = vpop.f32.mrb[61].mxu1  ;;  %v1572_v34 = vpop.f32.mrb[61].mxu0 }
 0x174   : > { %v2265_v15 = vadd.f32 %v2264_v28, %v2263_v46  ;;  %v1573_v7 = vadd.f32 %v1572_v34, %v2880_v37  ;;  %v2266_v30 = vpop.f32.mrb[62].mxu1  ;;  %v2348_v31 = vpop.f32.mrb[62].mxu0 }
 0x175   : > { %v1771_v36 = vadd.f32 %v2896_v63, %v1581_v52  ;;  %v1584_v53 = vadd.f32 %v2348_v31, %v2890_v16  ;;  %v2267_v49 = vpop.f32.mrb[63].mxu1  ;;  %v1575_v35 = vpop.f32.mrb[63].mxu0 }
 0x176   : > { %v1769_v5 = vadd.f32 %v2896_v63, %v1573_v7  ;;  %v2268_v40 = vadd.f32 %v2267_v49, %v2266_v30  ;;  %v1576_v39 = vadd.f32 %v1575_v35, %v2882_v61  ;;  %v1452_v22 = vadd.f32 %v2265_v15, %v2884_v47 }
 0x177   : > { %1803 = vst [vmem:[%s2902_s12 + $0x70] sm:$0xff] %v1771_v36  ;;  %v1772_v37 = vadd.f32 %v2896_v63, %v1584_v53 }
 0x178   : > { %1801 = vst [vmem:[%s2902_s12 + $0x60] sm:$0xff] %v1769_v5  ;;  %v1770_v57 = vadd.f32 %v2896_v63, %v1576_v39  ;;  %v1455_v44 = vadd.f32 %v2268_v40, %v2886_v56 }
 0x179   : > { %1804 = vst [vmem:[%s2902_s12 + $0x78] sm:$0xff] %v1772_v37 }
 0x17a   : > { %1802 = vst [vmem:[%s2902_s12 + $0x68] sm:$0xff] %v1770_v57  ;;  %v2269_v16 = vpop.f32.mrb[64].mxu1  ;;  %v2351_v27 = vpop.f32.mrb[64].mxu0 }
 0x17b   : > { %v1597_v45 = vadd.f32 %v2351_v27, %v1436_v54  ;;  %v2270_v48 = vpop.f32.mrb[65].mxu1  ;;  %v1588_v50 = vpop.f32.mrb[65].mxu0 }
 0x17c   : > { %v2271_v61 = vadd.f32 %v2270_v48, %v2269_v16  ;;  %v1589_v47 = vadd.f32 %v1588_v50, %v2910_v10  ;;  %v2272_v42 = vpop.f32.mrb[66].mxu1  ;;  %v2352_v24 = vpop.f32.mrb[66].mxu0 }
 0x17d   : > { %v1775_v55 = vadd.f32 %v2896_v63, %v1597_v45  ;;  %v1600_v43 = vadd.f32 %v2352_v24, %v1439_v23  ;;  %v2273_v56 = vpop.f32.mrb[67].mxu1  ;;  %v1591_v59 = vpop.f32.mrb[67].mxu0 }
 0x17e   : > { %v1773_v0 = vadd.f32 %v2896_v63, %v1589_v47  ;;  %v2274_v1 = vadd.f32 %v2273_v56, %v2272_v42  ;;  %v1592_v54 = vadd.f32 %v1591_v59, %v2917_v29  ;;  %v1460_v25 = vadd.f32 %v2271_v61, %v2828_v60 }
 0x17f   : > { %1807 = vst [vmem:[%s2902_s12 + $0x90] sm:$0xff] %v1775_v55  ;;  %v1776_v4 = vadd.f32 %v2896_v63, %v1600_v43 }
 0x180   : > { %1805 = vst [vmem:[%s2902_s12 + $0x80] sm:$0xff] %v1773_v0  ;;  %v1774_v10 = vadd.f32 %v2896_v63, %v1592_v54  ;;  %v1463_v62 = vadd.f32 %v2274_v1, %v2830_v2 }
 0x181   : > { %1808 = vst [vmem:[%s2902_s12 + $0x98] sm:$0xff] %v1776_v4 }
 0x182   : > { %1806 = vst [vmem:[%s2902_s12 + $0x88] sm:$0xff] %v1774_v10  ;;  %v2275_v23 = vpop.f32.mrb[68].mxu1  ;;  %v2355_v33 = vpop.f32.mrb[68].mxu0 }
 0x183   : > { %v1613_v41 = vadd.f32 %v2355_v33, %v1452_v22  ;;  %v2276_v9 = vpop.f32.mrb[69].mxu1  ;;  %v1604_v13 = vpop.f32.mrb[69].mxu0 }
 0x184   : > { %v2277_v29 = vadd.f32 %v2276_v9, %v2275_v23  ;;  %v1605_v3 = vadd.f32 %v1604_v13, %v1444_v51  ;;  %v2278_v60 = vpop.f32.mrb[70].mxu1  ;;  %v2356_v11 = vpop.f32.mrb[70].mxu0 }
 0x185   : > { %v1779_v6 = vadd.f32 %v2896_v63, %v1613_v41  ;;  %v1616_v12 = vadd.f32 %v2356_v11, %v1455_v44  ;;  %v2279_v17 = vpop.f32.mrb[71].mxu1  ;;  %v1607_v2 = vpop.f32.mrb[71].mxu0 }
 0x186   : > { %v1777_v58 = vadd.f32 %v2896_v63, %v1605_v3  ;;  %v2280_v18 = vadd.f32 %v2279_v17, %v2278_v60  ;;  %v1608_v46 = vadd.f32 %v1607_v2, %v2947_v19  ;;  %v1468_v21 = vadd.f32 %v2277_v29, %v2832_v8 }
 0x187   : > { %1811 = vst [vmem:[%s2902_s12 + $0xb0] sm:$0xff] %v1779_v6  ;;  %v1780_v52 = vadd.f32 %v2896_v63, %v1616_v12 }
 0x188   : > { %1809 = vst [vmem:[%s2902_s12 + $0xa0] sm:$0xff] %v1777_v58  ;;  %v1778_v51 = vadd.f32 %v2896_v63, %v1608_v46  ;;  %v1471_v28 = vadd.f32 %v2280_v18, %v2834_v14 }
 0x189   : > { %1812 = vst [vmem:[%s2902_s12 + $0xb8] sm:$0xff] %v1780_v52 }
 0x18a   : > { %1810 = vst [vmem:[%s2902_s12 + $0xa8] sm:$0xff] %v1778_v51  ;;  %v2281_v34 = vpop.f32.mrb[72].mxu1  ;;  %v2359_v15 = vpop.f32.mrb[72].mxu0 }
 0x18b   : > { %v1629_v7 = vadd.f32 %v2359_v15, %v1468_v21  ;;  %v2282_v30 = vpop.f32.mrb[73].mxu1  ;;  %v1620_v31 = vpop.f32.mrb[73].mxu0 }
 0x18c   : > { %v2283_v19 = vadd.f32 %v2282_v30, %v2281_v34  ;;  %v1621_v36 = vadd.f32 %v1620_v31, %v1460_v25  ;;  %v2284_v8 = vpop.f32.mrb[74].mxu1  ;;  %v2360_v53 = vpop.f32.mrb[74].mxu0 }
 0x18d   : > { %v1783_v49 = vadd.f32 %v2896_v63, %v1629_v7  ;;  %v1632_v35 = vadd.f32 %v2360_v53, %v1471_v28  ;;  %v2285_v5 = vpop.f32.mrb[75].mxu1  ;;  %v1623_v14 = vpop.f32.mrb[75].mxu0 }
 0x18e   : > { %v1781_v40 = vadd.f32 %v2896_v63, %v1621_v36  ;;  %v2286_v39 = vadd.f32 %v2285_v5, %v2284_v8  ;;  %v1624_v22 = vadd.f32 %v1623_v14, %v1463_v62  ;;  %v1476_v37 = vadd.f32 %v2283_v19, %v2836_v20 }
 0x18f   : > { %1815 = vst [vmem:[%s2902_s12 + $0xd0] sm:$0xff] %v1783_v49  ;;  %v1784_v57 = vadd.f32 %v2896_v63, %v1632_v35 }
 0x190   : > { %1813 = vst [vmem:[%s2902_s12 + $0xc0] sm:$0xff] %v1781_v40  ;;  %v1782_v44 = vadd.f32 %v2896_v63, %v1624_v22  ;;  %v1479_v16 = vadd.f32 %v2286_v39, %v2838_v26 }
 0x191   : > { %1816 = vst [vmem:[%s2902_s12 + $0xd8] sm:$0xff] %v1784_v57 }
 0x192   : > { %1814 = vst [vmem:[%s2902_s12 + $0xc8] sm:$0xff] %v1782_v44  ;;  %v2287_v27 = vpop.f32.mrb[76].mxu1  ;;  %v2363_v45 = vpop.f32.mrb[76].mxu0 }
 0x193   : > { %v2288_v48 = vpop.f32.mrb[77].mxu1  ;;  %v1636_v50 = vpop.f32.mrb[77].mxu0 }
 0x194   : > { %v2289_v61 = vadd.f32 %v2288_v48, %v2287_v27  ;;  %v1637_v47 = vadd.f32 %v1636_v50, %v1476_v37  ;;  %v2290_v20 = vpop.f32.mrb[78].mxu1  ;;  %v2364_v42 = vpop.f32.mrb[78].mxu0 }
 0x195   : > { %v2291_v24 = vpop.f32.mrb[79].mxu1  ;;  %v1639_v55 = vpop.f32.mrb[79].mxu0 }
 0x196   : > { %v1484_v43 = vadd.f32 %v2289_v61, %v2840_v32  ;;  %v1785_v26 = vadd.f32 %v2896_v63, %v1637_v47  ;;  %v2292_v56 = vadd.f32 %v2291_v24, %v2290_v20  ;;  %v1640_v59 = vadd.f32 %v1639_v55, %v1479_v16 }
 0x198   : > { %v1645_v0 = vadd.f32 %v2363_v45, %v1484_v43  ;;  %1817 = vst [vmem:[%s2902_s12 + $0xe0] sm:$0xff] %v1785_v26  ;;  %v1487_v1 = vadd.f32 %v2292_v56, %v2842_v38  ;;  %v1786_v54 = vadd.f32 %v2896_v63, %v1640_v59 }
 0x19a   : > { %v1787_v25 = vadd.f32 %v2896_v63, %v1645_v0  ;;  %v1648_v4 = vadd.f32 %v2364_v42, %v1487_v1  ;;  %1818 = vst [vmem:[%s2902_s12 + $0xe8] sm:$0xff] %v1786_v54 }
 0x19c   : > { %1819 = vst [vmem:[%s2902_s12 + $0xf0] sm:$0xff] %v1787_v25  ;;  %v1788_v10 = vadd.f32 %v2896_v63, %v1648_v4 }
 0x19e   : > { %1820 = vst [vmem:[%s2902_s12 + $0xf8] sm:$0xff] %v1788_v10 }
 0x19f PF: > { %s13_s14 = sadd.s32 1, %s2580_s14   ;;  %s3021_s12 = smov %s2576_s13 }
 0x1a0   : > { %p10_p5 = scmp.ge.s32.totalorder %s13_s14, 4   ;;  %s3022_s13 = smov %s3024_s15 }
 0x1a2   :  { %12 = sbr.rel (!%p10_p5) target bundleno = 2 (0x2), region = 76 }

</bundles_post_ra>
